<compile_context>
chip_gen: v6e
topology: v6e:2x2x1
jax: 0.10.0
libtpu: 0.0.40
codegen_flags: <defaults>
</compile_context>

<pallas_src>
import math
import functools

import jax
import jax.numpy as jnp
from jax import lax
from jax.experimental import pallas as pl
from jax.experimental.pallas import tpu as pltpu


def _gelu_exact(x):
    # nn.GELU() default = exact erf-based GELU.
    return 0.5 * x * (1.0 + lax.erf(x * (1.0 / math.sqrt(2.0))))


def _layernorm(x, gamma, beta, eps=1e-5):
    mu = jnp.mean(x, axis=-1, keepdims=True)
    var = jnp.mean((x - mu) ** 2, axis=-1, keepdims=True)
    return (x - mu) * lax.rsqrt(var + eps) * gamma + beta


def transformer_block_kernel(
    x_ref,
    ln1_w_ref, ln1_b_ref,
    wqkv_ref, bqkv_ref,
    wo_ref, bo_ref,
    ln2_w_ref, ln2_b_ref,
    w1_ref, b1_ref,
    w2_ref, b2_ref,
    o_ref,
    *,
    num_heads: int,
):
    f32 = jnp.float32
    cdt = wqkv_ref.dtype                      # MXU operand dtype (bf16)

    x = x_ref[0].astype(f32)                  # (S, D)
    S, D = x.shape
    H = num_heads
    dh = D // H
    scale = 1.0 / math.sqrt(dh)

    # ---- LayerNorm 1 (shared by q, k, v since attn(norm1(x), ...)) ----------
    xn = _layernorm(x, ln1_w_ref[0], ln1_b_ref[0])

    # ---- fused QKV projection: single MXU pass with N = 3D ------------------
    qkv = jnp.dot(xn.astype(cdt), wqkv_ref[...],
                  preferred_element_type=f32) + bqkv_ref[0]        # (S, 3D) f32

    # Split heads -> (H, S, dh): lane slices at dh boundaries, stacked along a
    # new leading (major) axis - no lane relayout of the whole context.
    def split_heads(block):
        return jnp.stack(
            [block[:, h * dh:(h + 1) * dh] for h in range(H)], axis=0)

    q = split_heads(qkv[:, 0 * D:1 * D]) * scale   # fold 1/sqrt(dh) into q
    k = split_heads(qkv[:, 1 * D:2 * D])
    v = split_heads(qkv[:, 2 * D:3 * D])

    # ---- head-batched attention (no per-head loop, no explicit .T) ----------
    s = jnp.einsum('hqd,hkd->hqk', q.astype(cdt), k.astype(cdt),
                   preferred_element_type=f32)                      # (H, S, S)
    m = jnp.max(s, axis=-1, keepdims=True)
    p = jnp.exp(s - m)
    p = p * pl.reciprocal(jnp.sum(p, axis=-1, keepdims=True), approx=True)
    ctx = jnp.einsum('hqk,hkd->hqd', p.astype(cdt), v.astype(cdt),
                     preferred_element_type=f32)                    # (H, S, dh)

    # ---- output projection fused over heads (no concat relayout) ------------
    # wo_ref is (H, dh, D): per-head slab of PyTorch out_proj.weight.T
    attn = jnp.einsum('hqd,hde->hqe', ctx.astype(cdt), wo_ref[...],
                      preferred_element_type=f32)                   # (H, S, D)
    attn_out = jnp.sum(attn, axis=0) + bo_ref[0]                    # (S, D)

    x1 = x + attn_out                          # residual 1 (f32)

    # ---- LayerNorm 2 + MLP ---------------------------------------------------
    xn2 = _layernorm(x1, ln2_w_ref[0], ln2_b_ref[0])
    h1 = jnp.dot(xn2.astype(cdt), w1_ref[...],
                 preferred_element_type=f32) + b1_ref[0]            # (S, mlp)
    h1 = _gelu_exact(h1)
    mlp = jnp.dot(h1.astype(cdt), w2_ref[...],
                  preferred_element_type=f32) + b2_ref[0]           # (S, D)

    o_ref[0] = (x1 + mlp).astype(o_ref.dtype)  # residual 2


def prepare_params(params, *, num_heads, compute_dtype=jnp.bfloat16):
    """One-time conversion of PyTorch-layout params to kernel layout.

    PyTorch nn.Linear stores W as (out, in); the kernel computes x @ W, so
    weights are transposed HERE (once), not on every forward call.  Matmul
    operands are cast to `compute_dtype` (bf16 -> native MXU on v6e/v7x);
    biases / LayerNorm params stay f32 (they feed f32 VPU math).
    """
    f32 = jnp.float32
    cdt = compute_dtype
    D = params["out_proj_w"].shape[0]
    Hm = params["fc1_w"].shape[0]
    dh = D // num_heads

    return {
        "ln1_w": params["ln1_w"].reshape(1, D).astype(f32),
        "ln1_b": params["ln1_b"].reshape(1, D).astype(f32),
        "wqkv": params["in_proj_w"].T.astype(cdt),                 # (D, 3D)
        "bqkv": params["in_proj_b"].reshape(1, 3 * D).astype(f32),
        "wo":   params["out_proj_w"].T.reshape(num_heads, dh, D).astype(cdt),
        "bo":   params["out_proj_b"].reshape(1, D).astype(f32),
        "ln2_w": params["ln2_w"].reshape(1, D).astype(f32),
        "ln2_b": params["ln2_b"].reshape(1, D).astype(f32),
        "w1":   params["fc1_w"].T.astype(cdt),                     # (D, Hm)
        "b1":   params["fc1_b"].reshape(1, Hm).astype(f32),
        "w2":   params["fc2_w"].T.astype(cdt),                     # (Hm, D)
        "b2":   params["fc2_b"].reshape(1, D).astype(f32),
    }


def transformer_block(x, prepared, *, num_heads):
    B, S, D = x.shape

    weight_args = (
        prepared["ln1_w"], prepared["ln1_b"],
        prepared["wqkv"], prepared["bqkv"],
        prepared["wo"], prepared["bo"],
        prepared["ln2_w"], prepared["ln2_b"],
        prepared["w1"], prepared["b1"],
        prepared["w2"], prepared["b2"],
    )

    # Grid-invariant weights: whole-array resident in VMEM (single buffer, one
    # copy-in) instead of double-buffered per-grid-step blocks.
    weight_specs = [pl.BlockSpec(memory_space=pltpu.MemorySpace.VMEM)
                    for _ in weight_args]

    kernel = functools.partial(transformer_block_kernel, num_heads=num_heads)

    # TODO(synk): for long sequences / large D on v7x (64 MiB VMEM), tile the
    # sequence dimension with a flash-style online softmax + K-tiled MLP
    # instead of holding the full (S, S) scores and (S, mlp) hidden per step.
    return pl.pallas_call(
        kernel,
        out_shape=jax.ShapeDtypeStruct((B, S, D), x.dtype),
        grid_spec=pltpu.PrefetchScalarGridSpec(
            num_scalar_prefetch=0,
            grid=(B,),
            in_specs=[pl.BlockSpec((1, S, D), lambda b: (b, 0, 0))]
                     + weight_specs,
            out_specs=pl.BlockSpec((1, S, D), lambda b: (b, 0, 0)),
        ),
        compiler_params=pltpu.CompilerParams(
            dimension_semantics=("parallel",)),
    )(x, *weight_args)


# ------------------------- pure-JAX reference check --------------------------
def reference(x, params, *, num_heads):
    B, S, D = x.shape
    dh = D // num_heads

    def ln(v, g, b):
        mu = jnp.mean(v, -1, keepdims=True)
        var = jnp.mean((v - mu) ** 2, -1, keepdims=True)
        return (v - mu) / jnp.sqrt(var + 1e-5) * g + b

    xn = ln(x, params["ln1_w"], params["ln1_b"])
    qkv = xn @ params["in_proj_w"].T + params["in_proj_b"]
    q, k, v = jnp.split(qkv, 3, axis=-1)
    q = q.reshape(B, S, num_heads, dh).transpose(0, 2, 1, 3)
    k = k.reshape(B, S, num_heads, dh).transpose(0, 2, 1, 3)
    v = v.reshape(B, S, num_heads, dh).transpose(0, 2, 1, 3)
    s = jnp.einsum("bhqd,bhkd->bhqk", q, k) / math.sqrt(dh)
    p = jax.nn.softmax(s, axis=-1)
    ctx = jnp.einsum("bhqk,bhkd->bhqd", p, v).transpose(0, 2, 1, 3).reshape(B, S, D)
    attn_out = ctx @ params["out_proj_w"].T + params["out_proj_b"]
    x1 = x + attn_out
    xn2 = ln(x1, params["ln2_w"], params["ln2_b"])
    h = jax.nn.gelu(xn2 @ params["fc1_w"].T + params["fc1_b"], approximate=False)
    mlp = h @ params["fc2_w"].T + params["fc2_b"]
    return x1 + mlp


if __name__ == "__main__":
    # D is a multiple of 128 so all lane-axis slices / stores are lane-dense.
    B, S, D = 2, 16, 128
    num_heads = 4          # dh = 32
    mlp_dim = 256

    key = jax.random.PRNGKey(0)
    keys = jax.random.split(key, 10)

    params = {
        "ln1_w": jnp.ones((D,), jnp.float32),
        "ln1_b": jnp.zeros((D,), jnp.float32),
        "in_proj_w": 0.1 * jax.random.normal(keys[0], (3 * D, D), jnp.float32),
        "in_proj_b": 0.1 * jax.random.normal(keys[1], (3 * D,), jnp.float32),
        "out_proj_w": 0.1 * jax.random.normal(keys[2], (D, D), jnp.float32),
        "out_proj_b": 0.1 * jax.random.normal(keys[3], (D,), jnp.float32),
        "ln2_w": jnp.ones((D,), jnp.float32),
        "ln2_b": jnp.zeros((D,), jnp.float32),
        "fc1_w": 0.1 * jax.random.normal(keys[4], (mlp_dim, D), jnp.float32),
        "fc1_b": 0.1 * jax.random.normal(keys[5], (mlp_dim,), jnp.float32),
        "fc2_w": 0.1 * jax.random.normal(keys[6], (D, mlp_dim), jnp.float32),
        "fc2_b": 0.1 * jax.random.normal(keys[7], (D,), jnp.float32),
    }

    x = jax.random.normal(keys[8], (B, S, D), jnp.float32)

    prepared = prepare_params(params, num_heads=num_heads)   # one-time prep
    out = transformer_block(x, prepared, num_heads=num_heads)
    out = jax.block_until_ready(out)

    ref = reference(x, params, num_heads=num_heads)
    assert out.shape == (B, S, D)
    max_err = float(jnp.max(jnp.abs(out - ref)))
    # bf16 MXU operands + f32 accumulation -> small mixed-precision error.
    assert jnp.allclose(out, ref, atol=5e-2, rtol=5e-2), (
        f"mismatch vs reference (max abs err {max_err})")

    print("KERNEL_OK")
</pallas_src>

<mosaic_0001>
module attributes {stable_mosaic.version = 11 : i64} {
  func.func @transformer_block_kernel(%arg0: i32, %arg1: memref<1x16x128xf32, #tpu.memory_space<vmem>>, %arg2: memref<1x128xf32, #tpu.memory_space<vmem>>, %arg3: memref<1x128xf32, #tpu.memory_space<vmem>>, %arg4: memref<128x384xbf16, #tpu.memory_space<vmem>>, %arg5: memref<1x384xf32, #tpu.memory_space<vmem>>, %arg6: memref<4x32x128xbf16, #tpu.memory_space<vmem>>, %arg7: memref<1x128xf32, #tpu.memory_space<vmem>>, %arg8: memref<1x128xf32, #tpu.memory_space<vmem>>, %arg9: memref<1x128xf32, #tpu.memory_space<vmem>>, %arg10: memref<128x256xbf16, #tpu.memory_space<vmem>>, %arg11: memref<1x256xf32, #tpu.memory_space<vmem>>, %arg12: memref<256x128xbf16, #tpu.memory_space<vmem>>, %arg13: memref<1x128xf32, #tpu.memory_space<vmem>>, %arg14: memref<1x16x128xf32, #tpu.memory_space<vmem>>) attributes {dimension_semantics = [#tpu.dimension_semantics<parallel>], iteration_bounds = array<i64: 2>, scalar_prefetch = 0 : i64, scratch_operands = 0 : i64, tpu.core_type = #tpu.core_type<tc>, window_params = [{transform_indices = @transform_0, window_bounds = array<i64: 1, 16, 128>}, {pipeline_mode = #tpu.pipeline_mode<synchronous>, transform_indices = @transform_1, window_bounds = array<i64: 1, 128>}, {pipeline_mode = #tpu.pipeline_mode<synchronous>, transform_indices = @transform_2, window_bounds = array<i64: 1, 128>}, {pipeline_mode = #tpu.pipeline_mode<synchronous>, transform_indices = @transform_3, window_bounds = array<i64: 128, 384>}, {pipeline_mode = #tpu.pipeline_mode<synchronous>, transform_indices = @transform_4, window_bounds = array<i64: 1, 384>}, {pipeline_mode = #tpu.pipeline_mode<synchronous>, transform_indices = @transform_5, window_bounds = array<i64: 4, 32, 128>}, {pipeline_mode = #tpu.pipeline_mode<synchronous>, transform_indices = @transform_6, window_bounds = array<i64: 1, 128>}, {pipeline_mode = #tpu.pipeline_mode<synchronous>, transform_indices = @transform_7, window_bounds = array<i64: 1, 128>}, {pipeline_mode = #tpu.pipeline_mode<synchronous>, transform_indices = @transform_8, window_bounds = array<i64: 1, 128>}, {pipeline_mode = #tpu.pipeline_mode<synchronous>, transform_indices = @transform_9, window_bounds = array<i64: 128, 256>}, {pipeline_mode = #tpu.pipeline_mode<synchronous>, transform_indices = @transform_10, window_bounds = array<i64: 1, 256>}, {pipeline_mode = #tpu.pipeline_mode<synchronous>, transform_indices = @transform_11, window_bounds = array<i64: 256, 128>}, {pipeline_mode = #tpu.pipeline_mode<synchronous>, transform_indices = @transform_12, window_bounds = array<i64: 1, 128>}, {transform_indices = @transform_13, window_bounds = array<i64: 1, 16, 128>}]} {
    %c0 = arith.constant 0 : index
    %c0_0 = arith.constant 0 : index
    %c0_1 = arith.constant 0 : index
    %0 = vector.load %arg1[%c0, %c0_0, %c0_1] : memref<1x16x128xf32, #tpu.memory_space<vmem>>, vector<1x16x128xf32>
    %1 = vector.shape_cast %0 : vector<1x16x128xf32> to vector<16x128xf32>
    %c0_2 = arith.constant 0 : index
    %c0_3 = arith.constant 0 : index
    %2 = vector.load %arg2[%c0_2, %c0_3] : memref<1x128xf32, #tpu.memory_space<vmem>>, vector<1x128xf32>
    %3 = vector.shape_cast %2 : vector<1x128xf32> to vector<128xf32>
    %c0_4 = arith.constant 0 : index
    %c0_5 = arith.constant 0 : index
    %4 = vector.load %arg3[%c0_4, %c0_5] : memref<1x128xf32, #tpu.memory_space<vmem>>, vector<1x128xf32>
    %5 = vector.shape_cast %4 : vector<1x128xf32> to vector<128xf32>
    %cst = arith.constant dense<0.000000e+00> : vector<16xf32>
    %6 = vector.multi_reduction <add>, %1, %cst [1] : vector<16x128xf32> to vector<16xf32>
    %7 = vector.shape_cast %6 : vector<16xf32> to vector<16x1xf32>
    %cst_6 = arith.constant 1.280000e+02 : f32
    %8 = vector.broadcast %cst_6 : f32 to vector<16x1xf32>
    %9 = arith.divf %7, %8 : vector<16x1xf32>
    %10 = vector.broadcast %9 : vector<16x1xf32> to vector<16x128xf32>
    %11 = arith.subf %1, %10 : vector<16x128xf32>
    %12 = arith.mulf %11, %11 : vector<16x128xf32>
    %cst_7 = arith.constant dense<0.000000e+00> : vector<16xf32>
    %13 = vector.multi_reduction <add>, %12, %cst_7 [1] : vector<16x128xf32> to vector<16xf32>
    %14 = vector.shape_cast %13 : vector<16xf32> to vector<16x1xf32>
    %cst_8 = arith.constant 1.280000e+02 : f32
    %15 = vector.broadcast %cst_8 : f32 to vector<16x1xf32>
    %16 = arith.divf %14, %15 : vector<16x1xf32>
    %17 = vector.broadcast %9 : vector<16x1xf32> to vector<16x128xf32>
    %18 = arith.subf %1, %17 : vector<16x128xf32>
    %cst_9 = arith.constant 9.99999974E-6 : f32
    %19 = vector.broadcast %cst_9 : f32 to vector<16x1xf32>
    %20 = arith.addf %16, %19 : vector<16x1xf32>
    %21 = math.rsqrt %20 : vector<16x1xf32>
    %22 = vector.broadcast %21 : vector<16x1xf32> to vector<16x128xf32>
    %23 = arith.mulf %18, %22 : vector<16x128xf32>
    %24 = vector.shape_cast %3 : vector<128xf32> to vector<1x128xf32>
    %25 = vector.broadcast %24 : vector<1x128xf32> to vector<16x128xf32>
    %26 = arith.mulf %23, %25 : vector<16x128xf32>
    %27 = vector.shape_cast %5 : vector<128xf32> to vector<1x128xf32>
    %28 = vector.broadcast %27 : vector<1x128xf32> to vector<16x128xf32>
    %29 = arith.addf %26, %28 : vector<16x128xf32>
    %30 = arith.truncf %29 : vector<16x128xf32> to vector<16x128xbf16>
    %c0_10 = arith.constant 0 : index
    %c0_11 = arith.constant 0 : index
    %31 = vector.load %arg4[%c0_10, %c0_11] : memref<128x384xbf16, #tpu.memory_space<vmem>>, vector<128x384xbf16>
    %cst_12 = arith.constant dense<0.000000e+00> : vector<16x384xf32>
    %32 = tpu.matmul %30, %31, %cst_12 {dimension_numbers = #tpu.dot_dimension_numbers<[1], [0], [0], [1], [0, 0, 1, 1], [], []>} : vector<16x128xbf16>, vector<128x384xbf16>, vector<16x384xf32> -> vector<16x384xf32>
    %c0_13 = arith.constant 0 : index
    %c0_14 = arith.constant 0 : index
    %33 = vector.load %arg5[%c0_13, %c0_14] : memref<1x384xf32, #tpu.memory_space<vmem>>, vector<1x384xf32>
    %34 = vector.shape_cast %33 : vector<1x384xf32> to vector<384xf32>
    %35 = vector.shape_cast %34 : vector<384xf32> to vector<1x384xf32>
    %36 = vector.broadcast %35 : vector<1x384xf32> to vector<16x384xf32>
    %37 = arith.addf %32, %36 : vector<16x384xf32>
    %38 = vector.extract_strided_slice %37 {offsets = [0, 0], sizes = [16, 128], strides = [1, 1]} : vector<16x384xf32> to vector<16x128xf32>
    %39 = vector.extract_strided_slice %38 {offsets = [0, 0], sizes = [16, 32], strides = [1, 1]} : vector<16x128xf32> to vector<16x32xf32>
    %40 = vector.extract_strided_slice %38 {offsets = [0, 32], sizes = [16, 32], strides = [1, 1]} : vector<16x128xf32> to vector<16x32xf32>
    %41 = vector.extract_strided_slice %38 {offsets = [0, 64], sizes = [16, 32], strides = [1, 1]} : vector<16x128xf32> to vector<16x32xf32>
    %42 = vector.extract_strided_slice %38 {offsets = [0, 96], sizes = [16, 32], strides = [1, 1]} : vector<16x128xf32> to vector<16x32xf32>
    %43 = vector.shape_cast %39 : vector<16x32xf32> to vector<1x16x32xf32>
    %44 = vector.shape_cast %40 : vector<16x32xf32> to vector<1x16x32xf32>
    %45 = vector.shape_cast %41 : vector<16x32xf32> to vector<1x16x32xf32>
    %46 = vector.shape_cast %42 : vector<16x32xf32> to vector<1x16x32xf32>
    %47 = tpu.concatenate %43, %44, %45, %46 in 0 : vector<1x16x32xf32>, vector<1x16x32xf32>, vector<1x16x32xf32>, vector<1x16x32xf32> -> vector<4x16x32xf32>
    %cst_15 = arith.constant 0.176776692 : f32
    %48 = vector.broadcast %cst_15 : f32 to vector<4x16x32xf32>
    %49 = arith.mulf %47, %48 : vector<4x16x32xf32>
    %50 = vector.extract_strided_slice %37 {offsets = [0, 128], sizes = [16, 128], strides = [1, 1]} : vector<16x384xf32> to vector<16x128xf32>
    %51 = vector.extract_strided_slice %50 {offsets = [0, 0], sizes = [16, 32], strides = [1, 1]} : vector<16x128xf32> to vector<16x32xf32>
    %52 = vector.extract_strided_slice %50 {offsets = [0, 32], sizes = [16, 32], strides = [1, 1]} : vector<16x128xf32> to vector<16x32xf32>
    %53 = vector.extract_strided_slice %50 {offsets = [0, 64], sizes = [16, 32], strides = [1, 1]} : vector<16x128xf32> to vector<16x32xf32>
    %54 = vector.extract_strided_slice %50 {offsets = [0, 96], sizes = [16, 32], strides = [1, 1]} : vector<16x128xf32> to vector<16x32xf32>
    %55 = vector.shape_cast %51 : vector<16x32xf32> to vector<1x16x32xf32>
    %56 = vector.shape_cast %52 : vector<16x32xf32> to vector<1x16x32xf32>
    %57 = vector.shape_cast %53 : vector<16x32xf32> to vector<1x16x32xf32>
    %58 = vector.shape_cast %54 : vector<16x32xf32> to vector<1x16x32xf32>
    %59 = tpu.concatenate %55, %56, %57, %58 in 0 : vector<1x16x32xf32>, vector<1x16x32xf32>, vector<1x16x32xf32>, vector<1x16x32xf32> -> vector<4x16x32xf32>
    %60 = vector.extract_strided_slice %37 {offsets = [0, 256], sizes = [16, 128], strides = [1, 1]} : vector<16x384xf32> to vector<16x128xf32>
    %61 = vector.extract_strided_slice %60 {offsets = [0, 0], sizes = [16, 32], strides = [1, 1]} : vector<16x128xf32> to vector<16x32xf32>
    %62 = vector.extract_strided_slice %60 {offsets = [0, 32], sizes = [16, 32], strides = [1, 1]} : vector<16x128xf32> to vector<16x32xf32>
    %63 = vector.extract_strided_slice %60 {offsets = [0, 64], sizes = [16, 32], strides = [1, 1]} : vector<16x128xf32> to vector<16x32xf32>
    %64 = vector.extract_strided_slice %60 {offsets = [0, 96], sizes = [16, 32], strides = [1, 1]} : vector<16x128xf32> to vector<16x32xf32>
    %65 = vector.shape_cast %61 : vector<16x32xf32> to vector<1x16x32xf32>
    %66 = vector.shape_cast %62 : vector<16x32xf32> to vector<1x16x32xf32>
    %67 = vector.shape_cast %63 : vector<16x32xf32> to vector<1x16x32xf32>
    %68 = vector.shape_cast %64 : vector<16x32xf32> to vector<1x16x32xf32>
    %69 = tpu.concatenate %65, %66, %67, %68 in 0 : vector<1x16x32xf32>, vector<1x16x32xf32>, vector<1x16x32xf32>, vector<1x16x32xf32> -> vector<4x16x32xf32>
    %70 = arith.truncf %49 : vector<4x16x32xf32> to vector<4x16x32xbf16>
    %71 = arith.truncf %59 : vector<4x16x32xf32> to vector<4x16x32xbf16>
    "tpu.trace_start"() <{level = 10 : i32, message = "hqd,hkd->hqk"}> : () -> ()
    %cst_16 = arith.constant dense<0.000000e+00> : vector<4x16x16xf32>
    %72 = tpu.matmul %70, %71, %cst_16 {dimension_numbers = #tpu.dot_dimension_numbers<[2], [2], [1], [1], [0, 0, 0, 1, 1, 1], [0], [0]>} : vector<4x16x32xbf16>, vector<4x16x32xbf16>, vector<4x16x16xf32> -> vector<4x16x16xf32>
    "tpu.trace_stop"() : () -> ()
    %cst_17 = arith.constant dense<0xFF800000> : vector<4x16xf32>
    %73 = vector.multi_reduction <maximumf>, %72, %cst_17 [2] : vector<4x16x16xf32> to vector<4x16xf32>
    %74 = vector.shape_cast %73 : vector<4x16xf32> to vector<4x16x1xf32>
    %75 = vector.broadcast %74 : vector<4x16x1xf32> to vector<4x16x16xf32>
    %76 = arith.subf %72, %75 : vector<4x16x16xf32>
    %77 = math.exp %76 : vector<4x16x16xf32>
    %cst_18 = arith.constant dense<0.000000e+00> : vector<4x16xf32>
    %78 = vector.multi_reduction <add>, %77, %cst_18 [2] : vector<4x16x16xf32> to vector<4x16xf32>
    %79 = vector.shape_cast %78 : vector<4x16xf32> to vector<4x16x1xf32>
    %80 = tpu.reciprocal %79 {approx = true} : vector<4x16x1xf32> -> vector<4x16x1xf32>
    %81 = vector.broadcast %80 : vector<4x16x1xf32> to vector<4x16x16xf32>
    %82 = arith.mulf %77, %81 : vector<4x16x16xf32>
    %83 = arith.truncf %82 : vector<4x16x16xf32> to vector<4x16x16xbf16>
    %84 = arith.truncf %69 : vector<4x16x32xf32> to vector<4x16x32xbf16>
    "tpu.trace_start"() <{level = 10 : i32, message = "hqk,hkd->hqd"}> : () -> ()
    %cst_19 = arith.constant dense<0.000000e+00> : vector<4x16x32xf32>
    %85 = tpu.matmul %83, %84, %cst_19 {dimension_numbers = #tpu.dot_dimension_numbers<[2], [1], [1], [2], [0, 0, 0, 1, 1, 2], [0], [0]>} : vector<4x16x16xbf16>, vector<4x16x32xbf16>, vector<4x16x32xf32> -> vector<4x16x32xf32>
    "tpu.trace_stop"() : () -> ()
    %86 = arith.truncf %85 : vector<4x16x32xf32> to vector<4x16x32xbf16>
    %c0_20 = arith.constant 0 : index
    %c0_21 = arith.constant 0 : index
    %c0_22 = arith.constant 0 : index
    %87 = vector.load %arg6[%c0_20, %c0_21, %c0_22] : memref<4x32x128xbf16, #tpu.memory_space<vmem>>, vector<4x32x128xbf16>
    "tpu.trace_start"() <{level = 10 : i32, message = "hqd,hde->hqe"}> : () -> ()
    %cst_23 = arith.constant dense<0.000000e+00> : vector<4x16x128xf32>
    %88 = tpu.matmul %86, %87, %cst_23 {dimension_numbers = #tpu.dot_dimension_numbers<[2], [1], [1], [2], [0, 0, 0, 1, 1, 2], [0], [0]>} : vector<4x16x32xbf16>, vector<4x32x128xbf16>, vector<4x16x128xf32> -> vector<4x16x128xf32>
    "tpu.trace_stop"() : () -> ()
    %cst_24 = arith.constant dense<0.000000e+00> : vector<16x128xf32>
    %89 = vector.multi_reduction <add>, %88, %cst_24 [0] : vector<4x16x128xf32> to vector<16x128xf32>
    %c0_25 = arith.constant 0 : index
    %c0_26 = arith.constant 0 : index
    %90 = vector.load %arg7[%c0_25, %c0_26] : memref<1x128xf32, #tpu.memory_space<vmem>>, vector<1x128xf32>
    %91 = vector.shape_cast %90 : vector<1x128xf32> to vector<128xf32>
    %92 = vector.shape_cast %91 : vector<128xf32> to vector<1x128xf32>
    %93 = vector.broadcast %92 : vector<1x128xf32> to vector<16x128xf32>
    %94 = arith.addf %89, %93 : vector<16x128xf32>
    %95 = arith.addf %1, %94 : vector<16x128xf32>
    %c0_27 = arith.constant 0 : index
    %c0_28 = arith.constant 0 : index
    %96 = vector.load %arg8[%c0_27, %c0_28] : memref<1x128xf32, #tpu.memory_space<vmem>>, vector<1x128xf32>
    %97 = vector.shape_cast %96 : vector<1x128xf32> to vector<128xf32>
    %c0_29 = arith.constant 0 : index
    %c0_30 = arith.constant 0 : index
    %98 = vector.load %arg9[%c0_29, %c0_30] : memref<1x128xf32, #tpu.memory_space<vmem>>, vector<1x128xf32>
    %99 = vector.shape_cast %98 : vector<1x128xf32> to vector<128xf32>
    %cst_31 = arith.constant dense<0.000000e+00> : vector<16xf32>
    %100 = vector.multi_reduction <add>, %95, %cst_31 [1] : vector<16x128xf32> to vector<16xf32>
    %101 = vector.shape_cast %100 : vector<16xf32> to vector<16x1xf32>
    %cst_32 = arith.constant 1.280000e+02 : f32
    %102 = vector.broadcast %cst_32 : f32 to vector<16x1xf32>
    %103 = arith.divf %101, %102 : vector<16x1xf32>
    %104 = vector.broadcast %103 : vector<16x1xf32> to vector<16x128xf32>
    %105 = arith.subf %95, %104 : vector<16x128xf32>
    %106 = arith.mulf %105, %105 : vector<16x128xf32>
    %cst_33 = arith.constant dense<0.000000e+00> : vector<16xf32>
    %107 = vector.multi_reduction <add>, %106, %cst_33 [1] : vector<16x128xf32> to vector<16xf32>
    %108 = vector.shape_cast %107 : vector<16xf32> to vector<16x1xf32>
    %cst_34 = arith.constant 1.280000e+02 : f32
    %109 = vector.broadcast %cst_34 : f32 to vector<16x1xf32>
    %110 = arith.divf %108, %109 : vector<16x1xf32>
    %111 = vector.broadcast %103 : vector<16x1xf32> to vector<16x128xf32>
    %112 = arith.subf %95, %111 : vector<16x128xf32>
    %cst_35 = arith.constant 9.99999974E-6 : f32
    %113 = vector.broadcast %cst_35 : f32 to vector<16x1xf32>
    %114 = arith.addf %110, %113 : vector<16x1xf32>
    %115 = math.rsqrt %114 : vector<16x1xf32>
    %116 = vector.broadcast %115 : vector<16x1xf32> to vector<16x128xf32>
    %117 = arith.mulf %112, %116 : vector<16x128xf32>
    %118 = vector.shape_cast %97 : vector<128xf32> to vector<1x128xf32>
    %119 = vector.broadcast %118 : vector<1x128xf32> to vector<16x128xf32>
    %120 = arith.mulf %117, %119 : vector<16x128xf32>
    %121 = vector.shape_cast %99 : vector<128xf32> to vector<1x128xf32>
    %122 = vector.broadcast %121 : vector<1x128xf32> to vector<16x128xf32>
    %123 = arith.addf %120, %122 : vector<16x128xf32>
    %124 = arith.truncf %123 : vector<16x128xf32> to vector<16x128xbf16>
    %c0_36 = arith.constant 0 : index
    %c0_37 = arith.constant 0 : index
    %125 = vector.load %arg10[%c0_36, %c0_37] : memref<128x256xbf16, #tpu.memory_space<vmem>>, vector<128x256xbf16>
    %cst_38 = arith.constant dense<0.000000e+00> : vector<16x256xf32>
    %126 = tpu.matmul %124, %125, %cst_38 {dimension_numbers = #tpu.dot_dimension_numbers<[1], [0], [0], [1], [0, 0, 1, 1], [], []>} : vector<16x128xbf16>, vector<128x256xbf16>, vector<16x256xf32> -> vector<16x256xf32>
    %c0_39 = arith.constant 0 : index
    %c0_40 = arith.constant 0 : index
    %127 = vector.load %arg11[%c0_39, %c0_40] : memref<1x256xf32, #tpu.memory_space<vmem>>, vector<1x256xf32>
    %128 = vector.shape_cast %127 : vector<1x256xf32> to vector<256xf32>
    %129 = vector.shape_cast %128 : vector<256xf32> to vector<1x256xf32>
    %130 = vector.broadcast %129 : vector<1x256xf32> to vector<16x256xf32>
    %131 = arith.addf %126, %130 : vector<16x256xf32>
    %cst_41 = arith.constant 5.000000e-01 : f32
    %132 = vector.broadcast %cst_41 : f32 to vector<16x256xf32>
    %133 = arith.mulf %132, %131 : vector<16x256xf32>
    %cst_42 = arith.constant 0.707106769 : f32
    %134 = vector.broadcast %cst_42 : f32 to vector<16x256xf32>
    %135 = arith.mulf %131, %134 : vector<16x256xf32>
    %136 = math.erf %135 : vector<16x256xf32>
    %cst_43 = arith.constant 1.000000e+00 : f32
    %137 = vector.broadcast %cst_43 : f32 to vector<16x256xf32>
    %138 = arith.addf %137, %136 : vector<16x256xf32>
    %139 = arith.mulf %133, %138 : vector<16x256xf32>
    %140 = arith.truncf %139 : vector<16x256xf32> to vector<16x256xbf16>
    %c0_44 = arith.constant 0 : index
    %c0_45 = arith.constant 0 : index
    %141 = vector.load %arg12[%c0_44, %c0_45] : memref<256x128xbf16, #tpu.memory_space<vmem>>, vector<256x128xbf16>
    %cst_46 = arith.constant dense<0.000000e+00> : vector<16x128xf32>
    %142 = tpu.matmul %140, %141, %cst_46 {dimension_numbers = #tpu.dot_dimension_numbers<[1], [0], [0], [1], [0, 0, 1, 1], [], []>} : vector<16x256xbf16>, vector<256x128xbf16>, vector<16x128xf32> -> vector<16x128xf32>
    %c0_47 = arith.constant 0 : index
    %c0_48 = arith.constant 0 : index
    %143 = vector.load %arg13[%c0_47, %c0_48] : memref<1x128xf32, #tpu.memory_space<vmem>>, vector<1x128xf32>
    %144 = vector.shape_cast %143 : vector<1x128xf32> to vector<128xf32>
    %145 = vector.shape_cast %144 : vector<128xf32> to vector<1x128xf32>
    %146 = vector.broadcast %145 : vector<1x128xf32> to vector<16x128xf32>
    %147 = arith.addf %142, %146 : vector<16x128xf32>
    %148 = arith.addf %95, %147 : vector<16x128xf32>
    %c0_49 = arith.constant 0 : index
    %c0_50 = arith.constant 0 : index
    %c0_51 = arith.constant 0 : index
    %149 = vector.load %arg14[%c0_49, %c0_50, %c0_51] : memref<1x16x128xf32, #tpu.memory_space<vmem>>, vector<1x16x128xf32>
    %150 = vector.shape_cast %149 : vector<1x16x128xf32> to vector<16x128xf32>
    %151 = vector.shape_cast %148 : vector<16x128xf32> to vector<1x16x128xf32>
    tpu.vector_store %arg14[%c0_49, %c0_50, %c0_51], %151 {strides = array<i32>} : memref<1x16x128xf32, #tpu.memory_space<vmem>>, vector<1x16x128xf32>,
    return
  }
  func.func @transform_0(%arg0: i32) -> (i32, i32, i32) {
    %c0_i32 = arith.constant 0 : i32
    %c0_i32_0 = arith.constant 0 : i32
    %c0_i32_1 = arith.constant 0 : i32
    return %arg0, %c0_i32, %c0_i32_0 : i32, i32, i32
  }
  func.func @transform_1(%arg0: i32) -> (i32, i32) {
    %c0_i32 = arith.constant 0 : i32
    %c0_i32_0 = arith.constant 0 : i32
    %c0_i32_1 = arith.constant 0 : i32
    return %c0_i32, %c0_i32_0 : i32, i32
  }
  func.func @transform_2(%arg0: i32) -> (i32, i32) {
    %c0_i32 = arith.constant 0 : i32
    %c0_i32_0 = arith.constant 0 : i32
    %c0_i32_1 = arith.constant 0 : i32
    return %c0_i32, %c0_i32_0 : i32, i32
  }
  func.func @transform_3(%arg0: i32) -> (i32, i32) {
    %c0_i32 = arith.constant 0 : i32
    %c0_i32_0 = arith.constant 0 : i32
    %c0_i32_1 = arith.constant 0 : i32
    return %c0_i32, %c0_i32_0 : i32, i32
  }
  func.func @transform_4(%arg0: i32) -> (i32, i32) {
    %c0_i32 = arith.constant 0 : i32
    %c0_i32_0 = arith.constant 0 : i32
    %c0_i32_1 = arith.constant 0 : i32
    return %c0_i32, %c0_i32_0 : i32, i32
  }
  func.func @transform_5(%arg0: i32) -> (i32, i32, i32) {
    %c0_i32 = arith.constant 0 : i32
    %c0_i32_0 = arith.constant 0 : i32
    %c0_i32_1 = arith.constant 0 : i32
    %c0_i32_2 = arith.constant 0 : i32
    return %c0_i32, %c0_i32_0, %c0_i32_1 : i32, i32, i32
  }
  func.func @transform_6(%arg0: i32) -> (i32, i32) {
    %c0_i32 = arith.constant 0 : i32
    %c0_i32_0 = arith.constant 0 : i32
    %c0_i32_1 = arith.constant 0 : i32
    return %c0_i32, %c0_i32_0 : i32, i32
  }
  func.func @transform_7(%arg0: i32) -> (i32, i32) {
    %c0_i32 = arith.constant 0 : i32
    %c0_i32_0 = arith.constant 0 : i32
    %c0_i32_1 = arith.constant 0 : i32
    return %c0_i32, %c0_i32_0 : i32, i32
  }
  func.func @transform_8(%arg0: i32) -> (i32, i32) {
    %c0_i32 = arith.constant 0 : i32
    %c0_i32_0 = arith.constant 0 : i32
    %c0_i32_1 = arith.constant 0 : i32
    return %c0_i32, %c0_i32_0 : i32, i32
  }
  func.func @transform_9(%arg0: i32) -> (i32, i32) {
    %c0_i32 = arith.constant 0 : i32
    %c0_i32_0 = arith.constant 0 : i32
    %c0_i32_1 = arith.constant 0 : i32
    return %c0_i32, %c0_i32_0 : i32, i32
  }
  func.func @transform_10(%arg0: i32) -> (i32, i32) {
    %c0_i32 = arith.constant 0 : i32
    %c0_i32_0 = arith.constant 0 : i32
    %c0_i32_1 = arith.constant 0 : i32
    return %c0_i32, %c0_i32_0 : i32, i32
  }
  func.func @transform_11(%arg0: i32) -> (i32, i32) {
    %c0_i32 = arith.constant 0 : i32
    %c0_i32_0 = arith.constant 0 : i32
    %c0_i32_1 = arith.constant 0 : i32
    return %c0_i32, %c0_i32_0 : i32, i32
  }
  func.func @transform_12(%arg0: i32) -> (i32, i32) {
    %c0_i32 = arith.constant 0 : i32
    %c0_i32_0 = arith.constant 0 : i32
    %c0_i32_1 = arith.constant 0 : i32
    return %c0_i32, %c0_i32_0 : i32, i32
  }
  func.func @transform_13(%arg0: i32) -> (i32, i32, i32) {
    %c0_i32 = arith.constant 0 : i32
    %c0_i32_0 = arith.constant 0 : i32
    %c0_i32_1 = arith.constant 0 : i32
    return %arg0, %c0_i32, %c0_i32_0 : i32, i32, i32
  }
}

</mosaic_0001>

<bundles_post_ra>
// kernel: tpu_custom_call.1
= control target key start
LH: loop header
LB: loop body
LE: loop exit
PB: predicated region body
PF: predicated region fallthrough
CT: control target
= control target key end

     0   :  { %s3513_s0 = inlined_call_operand.hbm [shape: f32[2,16,128], index: 0, kind: input, shape index: {}]   ;;  %s3514_s1 = inlined_call_operand.hbm [shape: f32[1,128], index: 1, kind: input, shape index: {}]   ;;  %s3515_s2 = inlined_call_operand.hbm [shape: f32[1,128], index: 2, kind: input, shape index: {}]   ;;  %s3516_s3 = inlined_call_operand.hbm [shape: bf16[128,384], index: 3, kind: input, shape index: {}]   ;;  %s3517_s4 = inlined_call_operand.vmem [shape: f32[1,384], index: 4, kind: input, shape index: {}]   ;;  %s3518_s5 = inlined_call_operand.hbm [shape: bf16[4,32,128], index: 5, kind: input, shape index: {}]   ;;  %s3519_s6 = inlined_call_operand.vmem [shape: f32[1,128], index: 6, kind: input, shape index: {}]   ;;  %s3520_s7 = inlined_call_operand.vmem [shape: f32[1,128], index: 7, kind: input, shape index: {}]   ;;  %s3521_s8 = inlined_call_operand.vmem [shape: f32[1,128], index: 8, kind: input, shape index: {}]   ;;  %s3522_s9 = inlined_call_operand.hbm [shape: bf16[128,256], index: 9, kind: input, shape index: {}]   ;;  %s3523_s10 = inlined_call_operand.vmem [shape: f32[1,256], index: 10, kind: input, shape index: {}]   ;;  %s3524_s11 = inlined_call_operand.hbm [shape: bf16[256,128], index: 11, kind: input, shape index: {}]   ;;  %s3525_s12 = inlined_call_operand.vmem [shape: f32[1,128], index: 12, kind: input, shape index: {}]   ;;  %s3526_s13 = inlined_call_operand.hbm [shape: f32[2,16,128], index: 13, kind: output, shape index: {}]  }
   0x1   :  { %3533 = sst [smem:[#allocation21_spill]] %s3514_s1 }
   0x2   :  { %3534 = sst [smem:[#allocation22_spill]] %s3515_s2 }
   0x3   :  { %3535 = sst [smem:[#allocation23_spill]] %s3516_s3 }
   0x4   :  { %3536 = sst [smem:[#allocation24_spill]] %s3518_s5 }
   0x5   :  { %3537 = sst [smem:[#allocation25_spill]] %s3522_s9 }
   0x6   :  { %3538 = sst [smem:[#allocation26_spill]] %s3524_s11 }
   0x7   :  { %18 = vsyncpa [#allocation3], 0 }
   0x8   :  { %20 = vsyncpa [#allocation3 + $0x1], 0 }
   0x9   :  { %21 = vsyncpa [#allocation6], 0 }
   0xa   :  { %22 = vsyncpa [#allocation9], 0 }
   0xb   :  { %23 = vsyncpa [#allocation12], 0 }
   0xc   :  { %24 = vsyncpa [#allocation4], 0 }
   0xd   :  { %26 = vsyncpa [#allocation4 + $0x1], 0  ;;  %s3089_s25 = smov 0   ;;  %s3091_s26 = smov 0  }
   0xe   :  { %s3093_s27 = smov 0   ;;  %s3095_s28 = smov 0  }
   0xf LB: > { %s2997_s29 = smov [#allocation5]   ;;  %s3110_s14 = sadd.s32 4294967295, %s2995_s28   ;;  %s2995_s28 = sphi %s3095_s28, %s3572_s28   ;;  %s2991_s27 = sphi %s3093_s27, %s3571_s27   ;;  %s2987_s26 = sphi %s3091_s26, %s3570_s26   ;;  %s2983_s25 = sphi %s3089_s25, %s3569_s25  }
  0x10   : > { %s354_s30 = sshll.u32 %s2997_s29, 4  ;;  %p2186_p0 = scmp.ge.s32.totalorder %s2995_s28, 1  ;;  %s355_s30 = int_to_ptr.vmem [resolvable:$true] %s354_s30 }
  0x11   : > { %p3527_p1 = scmp.eq.s32.totalorder %s3110_s14, 0  ;;  %p341_p2 = scmp.lt.s32.totalorder %s2995_s28, 3 }
  0x12   : > { %s2998_s16 = smov [#allocation8]   ;;  %s2999_s19 = smov [#allocation11]  }
  0x13   : > { %p3115_p3 = pnand %p2186_p0, %p341_p2  ;;  %s375_s17 = sshll.u32 %s2998_s16, 4  ;;  %s3122_s17 = int_to_ptr.vmem [resolvable:$true] %s375_s17 }
  0x14   : > { %s413_s20 = sshll.u32 %s2999_s19, 4  ;;  %s2746_s22 = scalar_lea.vmem %s355_s30, 16  ;;  %s3130_s20 = int_to_ptr.vmem [resolvable:$true] %s413_s20 }
  0x15   : > { %s3539_s15 = scalar_select %p3115_p3, 1, 0 }
  0x16   : > { %p2482_p5 = pneg %p3115_p3  ;;  %p2747_p8 = scmp.ne.s32.totalorder %s355_s30, %s2746_s22 }
  0x17   : > { %s2753_s23 = scalar_lea.vmem %s355_s30, 32  ;;  %p2754_p11 = scmp.lt.s32.totalorder %s355_s30, %s355_s30 }
  0x18   : > { %p3126_p6 = pnand %p2482_p5, %p3527_p1  ;;  %p2755_p12 = scmp.lt.s32.totalorder %s2753_s23, %s2746_s22 }
  0x1a   : > { %p3134_p7 = pneg %p3126_p6  ;;  %p2756_p13 = por %p2755_p12, %p2754_p11 }
  0x1c   : > { %p2749_p9 = pnand %p2747_p8, %p3134_p7 }
  0x1e   : > { %p2750_p10 = pneg %p2749_p9 }
  0x20   : > { %p2757_p0 = pnand %p2756_p13, %p2750_p10 }
  0x22   : > { %2760 = shalt.err (!%p2757_p0)
}
  0x23   : > { %s3542_s1 = sld [smem:[#allocation21_spill]]  ;;  %s2772_s16 = scalar_lea.vmem %s3122_s17, 3072 }
  0x24   : > { %p2773_p2 = scmp.ne.s32.totalorder %s3122_s17, %s2772_s16  ;;  %p2780_p9 = scmp.lt.s32.totalorder %s3122_s17, %s3122_s17 }
  0x25   : > { %p2781_p11 = scmp.lt.s32.totalorder %s2772_s16, %s2772_s16 }
  0x26   : > { %p2775_p5 = pnand %p2773_p2, %p3134_p7 }
  0x27   : > { %p2782_p10 = por %p2781_p11, %p2780_p9 }
  0x28   : > { %p2776_p8 = pneg %p2775_p5 }
  0x29   : > { %2485 = dma.hbm_to_vmem [thread:$0]  (!%p3126_p6), %s3542_s1, 16, %s355_s30, [#allocation6]  }
  0x2a   : > { %p2783_p12 = pnand %p2782_p10, %p2776_p8 }
  0x2c   : > { %2786 = shalt.err (!%p2783_p12)
}
  0x2d   : > { %s3000_s19 = smov 192   ;;  %s3001_s22 = smov 12  }
  0x2e   : > { %s3543_s3 = sld [smem:[#allocation23_spill]]  ;;  %s2798_s24 = scalar_lea.vmem %s3130_s20, 2048 }
  0x2f   : > { %p2799_p13 = scmp.ne.s32.totalorder %s3130_s20, %s2798_s24  ;;  %p2806_p5 = scmp.lt.s32.totalorder %s3130_s20, %s3130_s20 }
  0x30   : > { %p2807_p8 = scmp.lt.s32.totalorder %s2798_s24, %s2798_s24 }
  0x31   : > { %p2801_p0 = pnand %p2799_p13, %p3134_p7 }
  0x32   : > { %p2808_p9 = por %p2807_p8, %p2806_p5 }
  0x33   : > { %p2802_p2 = pneg %p2801_p0 }
  0x34   : > { %2491 = dma.hbm_to_vmem [thread:$0]  (!%p3126_p6), %s3543_s3, 3072, %s3122_s17, [#allocation9], %s3000_s19, %s3000_s19, %s3001_s22  }
  0x35   : > { %p2809_p11 = pnand %p2808_p9, %p2802_p2 }
  0x37   : > { %2812 = shalt.err (!%p2809_p11)
}
  0x38   : > { %s3529_s29 = smov 128   ;;  %s3530_s16 = smov 8  }
  0x39   : > { %s3544_s9 = sld [smem:[#allocation25_spill]]  ;;  %s3004_s22 = smov [#allocation7]  }
  0x3a   : > { %s365_s30 = sshll.u32 %s3004_s22, 4  ;;  %s3005_s23 = smov [#allocation10]   ;;  %s366_s30 = int_to_ptr.vmem [resolvable:$true] %s365_s30 }
  0x3b   : > { %s391_s24 = sshll.u32 %s3005_s23, 4  ;;  %s2824_s1 = scalar_lea.vmem %s366_s30, 16  ;;  %s392_s24 = int_to_ptr.vmem [resolvable:$true] %s391_s24 }
  0x3c   : > { %p2825_p10 = scmp.ne.s32.totalorder %s366_s30, %s2824_s1  ;;  %s2831_s3 = scalar_lea.vmem %s366_s30, 32 }
  0x3d   : > { %p2832_p0 = scmp.lt.s32.totalorder %s366_s30, %s366_s30  ;;  %p2833_p2 = scmp.lt.s32.totalorder %s2831_s3, %s2824_s1 }
  0x3e   : > { %p2827_p12 = pnand %p2825_p10, %p3134_p7 }
  0x3f   : > { %2497 = dma.hbm_to_vmem [thread:$0]  (!%p3126_p6), %s3544_s9, 2048, %s3130_s20, [#allocation12], %s3529_s29, %s3529_s29, %s3530_s16  }
  0x40   : > { %p2828_p13 = pneg %p2827_p12  ;;  %p2834_p5 = por %p2833_p2, %p2832_p0 }
  0x42   : > { %p2835_p8 = pnand %p2834_p5, %p2828_p13 }
  0x44   : > { %2838 = shalt.err (!%p2835_p8)
}
  0x45   : > { %s3545_s2 = sld [smem:[#allocation22_spill]]  ;;  %s2850_s19 = scalar_lea.vmem %s392_s24, 1024 }
  0x46   : > { %p2851_p9 = scmp.ne.s32.totalorder %s392_s24, %s2850_s19  ;;  %p2858_p12 = scmp.lt.s32.totalorder %s392_s24, %s392_s24 }
  0x47   : > { %p2859_p4 = scmp.lt.s32.totalorder %s2850_s19, %s2850_s19 }
  0x48   : > { %p2853_p11 = pnand %p2851_p9, %p3134_p7 }
  0x49   : > { %p2860_p1 = por %p2859_p4, %p2858_p12 }
  0x4a   : > { %p2854_p10 = pneg %p2853_p11 }
  0x4b   : > { %2488 = dma.hbm_to_vmem [thread:$0]  (!%p3126_p6), %s3545_s2, 16, %s366_s30, [#allocation6]  }
  0x4c   : > { %p2861_p3 = pnand %p2860_p1, %p2854_p10 }
  0x4e   : > { %2864 = shalt.err (!%p2861_p3)
}
  0x4f   : > { %s3006_s1 = smov 64   ;;  %s3007_s3 = smov 4  }
  0x50   : > { %s3546_s5 = sld [smem:[#allocation24_spill]]  ;;  %s3008_s30 = smov [#allocation13]  }
  0x51   : > { %s429_s17 = sshll.u32 %s3008_s30, 4  ;;  %s430_s17 = int_to_ptr.vmem [resolvable:$true] %s429_s17 }
  0x52   : > { %s2876_s20 = scalar_lea.vmem %s430_s17, 2048  ;;  %p2884_p4 = scmp.lt.s32.totalorder %s430_s17, %s430_s17 }
  0x53   : > { %p2877_p13 = scmp.ne.s32.totalorder %s430_s17, %s2876_s20  ;;  %p2885_p1 = scmp.lt.s32.totalorder %s2876_s20, %s2876_s20 }
  0x55   : > { %p2879_p0 = pnand %p2877_p13, %p3134_p7  ;;  %p2886_p3 = por %p2885_p1, %p2884_p4 }
  0x56   : > { %2494 = dma.hbm_to_vmem [thread:$0]  (!%p3126_p6), %s3546_s5, 1024, %s392_s24, [#allocation9], %s3006_s1, %s3006_s1, %s3007_s3  }
  0x57   : > { %p2880_p2 = pneg %p2879_p0 }
  0x59   : > { %p2887_p5 = pnand %p2886_p3, %p2880_p2 }
  0x5b   : > { %2890 = shalt.err (!%p2887_p5)
}
  0x5c   : > { %s3547_s11 = sld [smem:[#allocation26_spill]]  ;;  %s2185_s21 = sadd.s32 4294967294, %s2995_s28  }
  0x5d   : > { %s3195_s18 = sadd.s32 1, %s2995_s28   ;;  %s39_s24 = sadd.s32 1, %s2991_s27 }
  0x5e   : > { %s36_s29 = ssub.s32 %s2995_s28, %s3195_s18  ;;  %p46_p8 = scmp.ne.s32.totalorder %s2991_s27, %s2987_s26 }
  0x5f   : > { %p37_p7 = scmp.eq.s32.totalorder %s36_s29, 0  ;;  %p47_p9 = scmp.eq.s32.totalorder %s2995_s28, 0 }
  0x60   : > { %p52_p11 = scmp.ne.s32.totalorder %s2987_s26, %s2983_s25  ;;  %p3550_p12 = scmp.eq.s32.totalorder %s3110_s14, 0 }
  0x61   : > { %s3206_s22 = scalar_select %p37_p7, %s2991_s27, %s39_s24  }
  0x62   : > { %2500 = dma.hbm_to_vmem [thread:$0]  (!%p3126_p6), %s3547_s11, 2048, %s430_s17, [#allocation12], %s3006_s1, %s3006_s1, %s3007_s3  }
  0x63   : > { %3548 = sst [smem:[#allocation20_spill]] %s3206_s22  ;;  %p3208_p10 = por %p47_p9, %p46_p8 }
  0x64   : > { %p3214_p6 = por %p3550_p12, %p52_p11  ;;  %p328_p13 = scmp.eq.s32.totalorder %s3110_s14, 1 }
  0x65   : > { %p334_p0 = scmp.eq.s32.totalorder %s2185_s21, 1  ;;  %p2515_p2 = scmp.lt.s32.totalorder %s2995_s28, 2 }
  0x66   : > { %s3551_s1 = scalar_select %p3214_p6, 1, 0 }
  0x67   : > { %s446_s3 = sand.u32 1, %s2991_s27   ;;  %p3221_p4 = por %p328_p13, %p46_p8 }
  0x68   : > { %p3225_p1 = por %p334_p0, %p52_p11  ;;  %s2194_s20 = sshll.u32 %s446_s3, 4 }
  0x69   : > { %s3552_s30 = scalar_select %p3221_p4, 1, 0 }
  0x6a   : > { %s3553_s17 = scalar_select %p3225_p1, 1, 0 }
  0x6b   : > { %s2293_s19 = sshll.u32 %s2995_s28, 8  ;;  %s450_s21 = scalar_lea.vmem [#allocation2], %s2194_s20 }
  0x6c   : > { %s3233_s16 = scalar_lea.hbm %s3513_s0, %s2293_s19  ;;  %s457_s2 = sshll.u32 %s450_s21, 4  ;;  %s3235_s2 = int_to_ptr.vmem [resolvable:$true] %s457_s2 }
  0x6d   : > { %p3239_p3 = pnand %p2515_p2, %p3208_p10  ;;  %s3243_s9 = scalar_lea.sflag [#allocation3], %s446_s3 }
  0x6e   : > { %s2891_s11 = scalar_lea.hbm %s3233_s16, 256  ;;  %s2896_s20 = scalar_lea.hbm %s3513_s0, 512 }
  0x6f   : > { %p2892_p5 = scmp.ne.s32.totalorder %s3233_s16, %s2891_s11  ;;  %p2893_p7 = pneg %p3239_p3 }
  0x70   : > { %p2897_p11 = scmp.lt.s32.totalorder %s3233_s16, %s3513_s0  ;;  %p2898_p10 = scmp.lt.s32.totalorder %s2896_s20, %s2891_s11 }
  0x71   : > { %p2894_p8 = pnand %p2893_p7, %p2892_p5 }
  0x72   : > { %p2899_p12 = por %p2898_p10, %p2897_p11 }
  0x73   : > { %p2895_p9 = pneg %p2894_p8 }
  0x75   : > { %p2900_p13 = pnand %p2899_p12, %p2895_p9 }
  0x77   : > { %2903 = shalt.err (!%p2900_p13)
}
  0x78   : > { %s2904_s23 = scalar_lea.vmem %s3235_s2, 256  ;;  %s3009_s3 = smov [#allocation2]  }
  0x79   : > { %p2905_p0 = scmp.ne.s32.totalorder %s3235_s2, %s2904_s23  ;;  %s2909_s22 = sshll.u32 %s3009_s3, 4  ;;  %s2910_s22 = int_to_ptr.vmem [resolvable:$false] %s2909_s22 }
  0x7a   : > { %s2911_s19 = scalar_lea.vmem %s2910_s22, 512  ;;  %p2912_p8 = scmp.lt.s32.totalorder %s3235_s2, %s2910_s22 }
  0x7b   : > { %p2907_p2 = pnand %p2905_p0, %p2893_p7  ;;  %p2913_p1 = scmp.lt.s32.totalorder %s2911_s19, %s2904_s23 }
  0x7d   : > { %p2908_p5 = pneg %p2907_p2  ;;  %p2914_p4 = por %p2913_p1, %p2912_p8 }
  0x7f   : > { %p2915_p6 = pnand %p2914_p4, %p2908_p5 }
  0x81   : > { %2918 = shalt.err (!%p2915_p6)
}
  0x82   : > { %s3555_s11 = smov 8   ;;  %s3556_s29 = smov 128  }
  0x83   : > { %2504 = dma.hbm_to_vmem [thread:$0]  (!%p3239_p3), %s3233_s16, 256, %s3235_s2, %s3243_s9, %s3556_s29, %s3556_s29, %s3555_s11  }
  0x84   : > { %p3557_p7 = scmp.ne.s32.totalorder %s3539_s15, 0 }
  0x85   : > { %s3270_s20 = sand.u32 (!%p3557_p7), 1, %s2987_s26   ;;  %p3558_p6 = scmp.ne.s32.totalorder (!%p3557_p7), %s3551_s1, 0 }
  0x86   : > { %469 = sbr.rel (%p3557_p7) target bundleno = 2466 (0x9a2), region = 72  ;;  %s2198_s22 = sshll.u32 (!%p3557_p7), %s3270_s20, 4 }
  0x87   : > { %s472_s24 = scalar_lea.sflag (!%p3557_p7), [#allocation3], %s3270_s20  ;;  %s3276_s5 = scalar_lea.vmem (!%p3557_p7), [#allocation2], %s2198_s22 }
  0x8b   : > { %2962 = dma.done.wait (%p3558_p6), %s472_s24, 256  }
  0x8c   : > { %2964 = vsyncadd (%p3558_p6), %s472_s24, 4294967040  ;;  %p3559_p4 = scmp.eq.s32.totalorder %s3110_s14, 0 }
  0x8e   : > { %2966 = dma.done.wait (%p3559_p4), [#allocation6], 32   ;;  %p3560_p1 = pmov %p3559_p4 }
  0x90   : > { %2968 = vsyncadd (%p3560_p1), [#allocation6], 4294967264  ;;  %p3561_p3 = pmov %p3560_p1 }
  0x91   : > { %p3562_p9 = pmov %p3560_p1 }
  0x92   : > { %2970 = dma.done.wait (%p3561_p3), [#allocation9], 4096  }
  0x93   : > { %2972 = vsyncadd (%p3562_p9), [#allocation9], 4294963200  ;;  %p3563_p11 = pmov %p3560_p1 }
  0x94   : > { %p3564_p10 = pmov %p3560_p1 }
  0x95   : > { %2974 = dma.done.wait (%p3563_p11), [#allocation12], 4096  }
  0x96   : > { %2976 = vsyncadd (%p3564_p10), [#allocation12], 4294963200  ;;  %v543_v0 = vld [vmem:[%s3276_s5] sm:$0xff]  ;;  %v544_v1 = vld [vmem:[%s3276_s5 + $0x8] sm:$0xff]  ;;  %v3010_v4 = vmov 0.0   ;;  %v3011_v27 = vmov 0   ;;  %v621_v53 = vlaneseq }
  0x97   : > { %547 = vadd.xlane.f32.xlu0 %v543_v0  ;;  %v2605_v2 = vld [vmem:[#allocation8 + $0xac] ss:$12 sps:$4 sm:$0xff]   ;;  %v2607_v3 = vld [vmem:[#allocation8 + $0xa8] ss:$12 sps:$4 sm:$0xff]   ;;  %2354 = vmatprep.subr.bf16.mxu1 %v3010_v4  ;;  %v2608_v5 = vld [vmem:[#allocation8 + $0xb0] ss:$12 sps:$4 sm:$0xff]  }
  0x98   : > { %764 = vmatprep.subr.bf16.mxu0 %v2605_v2  ;;  %2355 = vmatpush3.bf16.msra.mxu1 %v2608_v5  ;;  %v2609_v14 = vld [vmem:[#allocation8 + $0x94] ss:$12 sps:$4 sm:$0xff]   ;;  %v2611_v15 = vld [vmem:[#allocation8 + $0x90] ss:$12 sps:$4 sm:$0xff]   ;;  %v2612_v16 = vld [vmem:[#allocation8 + $0x98] ss:$12 sps:$4 sm:$0xff]  }
  0x99   : > { %765 = vmatpush1.bf16.msra.mxu0 %v2607_v3  ;;  %2356 = vmatprep.subr.bf16.mxu1 %v3010_v4  ;;  %v2613_v17 = vld [vmem:[#allocation8 + $0x7c] ss:$12 sps:$4 sm:$0xff]   ;;  %v2615_v18 = vld [vmem:[#allocation8 + $0x78] ss:$12 sps:$4 sm:$0xff]   ;;  %v2616_v19 = vld [vmem:[#allocation8 + $0x80] ss:$12 sps:$4 sm:$0xff]  }
  0x9a   : > { %766 = vmatprep.subr.bf16.mxu0 %v2609_v14  ;;  %v2617_v20 = vld [vmem:[#allocation8 + $0x64] ss:$12 sps:$4 sm:$0xff]   ;;  %v2619_v21 = vld [vmem:[#allocation8 + $0x60] ss:$12 sps:$4 sm:$0xff]   ;;  %v2620_v22 = vld [vmem:[#allocation8 + $0x68] ss:$12 sps:$4 sm:$0xff]   ;;  %796 = vmatprep.mubr.bf16.mxu0 %v3011_v27 }
  0x9b   : > { %549 = vadd.xlane.f32.xlu0 %v544_v1  ;;  %v2621_v23 = vld [vmem:[#allocation8 + $0x4c] ss:$12 sps:$4 sm:$0xff]   ;;  %v2623_v24 = vld [vmem:[#allocation8 + $0x48] ss:$12 sps:$4 sm:$0xff]   ;;  %v2624_v25 = vld [vmem:[#allocation8 + $0x50] ss:$12 sps:$4 sm:$0xff]  }
  0x9c   : > { %2357 = vmatpush3.bf16.msra.mxu1 %v2612_v16  ;;  %v2625_v26 = vld [vmem:[#allocation8 + $0x34] ss:$12 sps:$4 sm:$0xff]   ;;  %vm3012_vm0 = vmmov 0   ;;  %v2627_v28 = vld [vmem:[#allocation8 + $0x30] ss:$12 sps:$4 sm:$0xff]   ;;  %v3323_v54 = vshrl.u32 %v621_v53, 7 }
  0x9d   : > { %767 = vmatpush1.bf16.msra.mxu0 %v2611_v15  ;;  %2358 = vmatprep.subr.bf16.mxu1 %v3010_v4  ;;  %v2628_v29 = vld [vmem:[#allocation8 + $0x38] ss:$12 sps:$4 sm:$0xff]   ;;  %v2629_v30 = vld [vmem:[#allocation8 + $0x1c] ss:$12 sps:$4 sm:$0xff]   ;;  %v2632_v32 = vld [vmem:[#allocation8 + $0x20] ss:$12 sps:$4 sm:$0xff]  }
  0x9e   : > { %768 = vmatprep.subr.bf16.mxu0 %v2613_v17  ;;  %2370 = vmatprep.mubr.msk.bf16.mxu1 %vm3012_vm0, %v3010_v4  ;;  %v2631_v31 = vld [vmem:[#allocation8 + $0x18] ss:$12 sps:$4 sm:$0xff]   ;;  %v2635_v34 = vld [vmem:[#allocation8] ss:$12 sps:$4 sm:$0xff]   ;;  %v2636_v35 = vld [vmem:[#allocation8 + $0x8] ss:$12 sps:$4 sm:$0xff]  }
  0x9f   : > { %v2633_v33 = vld [vmem:[#allocation8 + $0x4] ss:$12 sps:$4 sm:$0xff]   ;;  %v2206_v44 = vld [vmem:[#allocation5] ss:$0 sm:$0xff]  ;;  %v2207_v48 = vld [vmem:[#allocation7] ss:$0 sm:$0xff] }
  0xa0   : > { %2359 = vmatpush3.bf16.msra.mxu1 %v2616_v19  ;;  %v623_v55 = vsub.s32 0, %v3323_v54  ;;  %v619_v56 = vld [vmem:[%s3517_s4] sm:$0x7]  ;;  %v631_v58 = vsub.s32 2, %v3323_v54  ;;  %v627_v59 = vsub.s32 1, %v3323_v54  ;;  %s3013_s15 = smov 96  }
  0xa1   : > { %769 = vmatpush1.bf16.msra.mxu0 %v2615_v18  ;;  %2360 = vmatprep.subr.bf16.mxu1 %v3010_v4  ;;  %vm924_vm1 = vcmask 261120   ;;  %s3014_s16 = smov 64   ;;  %s3015_s1 = smov 32   ;;  %vm1113_vm2 = vcmask 130048  }
  0xa2   : > { %770 = vmatprep.subr.bf16.mxu0 %v2617_v20  ;;  %v624_v57 = vrot.slane %v619_v56, %v623_v55  ;;  %v632_v63 = vrot.slane %v619_v56, %v631_v58  ;;  %v628_v2 = vrot.slane %v619_v56, %v627_v59  ;;  %p3565_p13 = scmp.ne.s32.totalorder %s3552_s30, 0 }
  0xa4   : > { %2361 = vmatpush3.bf16.msra.mxu1 %v2620_v22 }
  0xa5   : > { %771 = vmatpush1.bf16.msra.mxu0 %v2619_v21  ;;  %2362 = vmatprep.subr.bf16.mxu1 %v3010_v4 }
  0xa6   : > { %772 = vmatprep.subr.bf16.mxu0 %v2621_v23 }
  0xa8   : > { %2363 = vmatpush3.bf16.msra.mxu1 %v2624_v25 }
  0xa9   : > { %773 = vmatpush1.bf16.msra.mxu0 %v2623_v24  ;;  %2364 = vmatprep.subr.bf16.mxu1 %v3010_v4 }
  0xaa   : > { %774 = vmatprep.subr.bf16.mxu0 %v2625_v26 }
  0xac   : > { %2365 = vmatpush3.bf16.msra.mxu1 %v2628_v29 }
  0xad   : > { %775 = vmatpush1.bf16.msra.mxu0 %v2627_v28  ;;  %2366 = vmatprep.subr.bf16.mxu1 %v3010_v4 }
  0xae   : > { %776 = vmatprep.subr.bf16.mxu0 %v2629_v30 }
  0xb0   : > { %2367 = vmatpush3.bf16.msra.mxu1 %v2632_v32 }
  0xb1   : > { %777 = vmatpush1.bf16.msra.mxu0 %v2631_v31  ;;  %2368 = vmatprep.subr.bf16.mxu1 %v3010_v4 }
  0xb2   : > { %778 = vmatprep.subr.bf16.mxu0 %v2633_v33 }
  0xb4   : > { %2369 = vmatpush3.bf16.msra.mxu1 %v2636_v35 }
  0xb5   : > { %779 = vmatpush1.bf16.msra.mxu0 %v2635_v34  ;;  %2380 = vmatprep.subr.bf16.mxu1 %v3010_v4 }
  0xb6   : > { %2374 = vmatprep.subr.bf16.mxu0 %v3010_v4 }
 0x120   : > { %v548_v6 = vpop.xlane.xlu0 %547 }
 0x121   : > { %v552_v7 = vmul.f32 0.0078125, %v548_v6 }
 0x123   : > { %v3298_v8 = vsub.f32 %v543_v0, %v552_v7 }
 0x124   : > { %v550_v9 = vpop.xlane.xlu0 %549 }
 0x125   : > { %v553_v10 = vmul.f32 0.0078125, %v550_v9  ;;  %v556_v11 = vmul.f32 %v3298_v8, %v3298_v8 }
 0x127   : > { %v3302_v12 = vsub.f32 %v544_v1, %v553_v10  ;;  %558 = vadd.xlane.f32.xlu1 %v556_v11 }
 0x129   : > { %v557_v13 = vmul.f32 %v3302_v12, %v3302_v12 }
 0x12b   : > { %560 = vadd.xlane.f32.xlu1 %v557_v13 }
 0x1b0   : > { %v559_v36 = vpop.xlane.xlu1 %558 }
 0x1b1   : > { %v562_v37 = vmul.f32 0.0078125, %v559_v36 }
 0x1b3   : > { %v564_v38 = vadd.f32 1e-05, %v562_v37 }
 0x1b4   : > { %v561_v39 = vpop.xlane.xlu1 %560 }
 0x1b5   : > { %2685 = vrsqrt.f32 %v564_v38  ;;  %v563_v40 = vmul.f32 0.0078125, %v561_v39 }
 0x1b7   : > { %v565_v41 = vadd.f32 1e-05, %v563_v40 }
 0x1b9   : > { %2687 = vrsqrt.f32 %v565_v41 }
 0x1c2   : > { %v2686_v42 = vpop.eup %2685 }
 0x1c3   : > { %v568_v43 = vmul.f32 %v2686_v42, %v3298_v8 }
 0x1c5   : > { %v576_v47 = vmul.f32 %v2206_v44, %v568_v43 }
 0x1c6   : > { %v2688_v45 = vpop.eup %2687 }
 0x1c7   : > { %v569_v46 = vmul.f32 %v2688_v45, %v3302_v12  ;;  %v584_v50 = vadd.f32 %v2207_v48, %v576_v47 }
 0x1c9   : > { %v577_v49 = vmul.f32 %v2206_v44, %v569_v46 }
 0x1cb   : > { %v585_v51 = vadd.f32 %v2207_v48, %v577_v49 }
 0x1cd   : > { %v586_v52 = vpack.c.bf16 %v585_v51, %v584_v50 }
 0x1cf   : > { %797 = vmatmul.mubr.bf16.vlgmr.msra.gmra.mxu0 %v586_v52  ;;  %2371 = vmatmul.mubr.bf16.vlgmr.msra.gmra.mxu1 %v586_v52 }
 0x1d0   : > { %2376 = vmatprep.mubr.msk.bf16.mxu0 %vm3012_vm0, %v3010_v4  ;;  %2382 = vmatprep.mubr.msk.bf16.mxu1 %vm3012_vm0, %v3010_v4 }
 0x28f   : > { %v798_v60 = vpop.f32.mrf.mxu0  ;;  %v841_v61 = vpop.f32.mrf.mxu1 }
 0x290   : > { %v799_v62 = vadd.f32 %v798_v60, %v624_v57  ;;  %v3336_v6 = vadd.f32 %v841_v61, %v632_v63 }
 0x291   : > { %v800_v0 = vpop.f32.mrf.mxu0  ;;  %v2372_v1 = vpop.f32.mrf.mxu1 }
 0x292   : > { %850 = vrot.lane.b32.xlu1 %v799_v62, %s3013_s15  ;;  %v801_v11 = vadd.f32 %v800_v0, %v628_v2  ;;  %v868_v19 = vmul.f32 0.17677669, %v799_v62 }
 0x293   : > { %v802_v3 = vpop.f32.mrf.mxu0  ;;  %v844_v5 = vpop.f32.mrf.mxu1 }
 0x294   : > { %v803_v7 = vadd.f32 %v802_v3, %v624_v57  ;;  %v3338_v8 = vadd.f32 %v844_v5, %v632_v63 }
 0x295   : > { %v804_v9 = vpop.f32.mrf.mxu0  ;;  %v2373_v10 = vpop.f32.mrf.mxu1 }
 0x296   : > { %v805_v12 = vadd.f32 %v804_v9, %v628_v2  ;;  %852 = vrot.lane.b32.xlu1 %v803_v7, %s3013_s15  ;;  %v1206_v13 = vpack.c.bf16 %v3338_v8, %v3336_v6  ;;  %v3345_v14 = vpack.i.bf16 %v3338_v8, %v3336_v6  ;;  %v869_v18 = vmul.f32 0.17677669, %v803_v7 }
 0x298   : > { %v2575_v15 = vpack.i.bf16 %v805_v12, %v801_v11  ;;  %v920_v16 = vpack.c.bf16 %v805_v12, %v801_v11  ;;  %v916_v20 = vpack.c.bf16 %v869_v18, %v868_v19 }
 0x29a   : > { %2576 = vrot.lane.b32.xlu0 %v2575_v15, %s3013_s15  ;;  %2581 = vrot.lane.b32.xlu1 %v2575_v15, %s3014_s16  ;;  %v929_v17 = vsel %vm924_vm1, %v920_v16, 0 }
 0x29b   : > { %2375 = vmatpush3.bf16.xpose.msra.mxu0 %v929_v17 }
 0x29c   : > { %2386 = vmatprep.subr.bf16.mxu0 %v3010_v4 }
 0x29e   : > { %2586 = vrot.lane.b32.xlu0 %v2575_v15, %s3015_s1  ;;  %856 = vrot.lane.b32.xlu1 %v799_v62, %s3014_s16 }
 0x2a2   : > { %858 = vrot.lane.b32.xlu0 %v803_v7, %s3014_s16  ;;  %862 = vrot.lane.b32.xlu1 %v799_v62, %s3015_s1 }
 0x2a3   : > { %2377 = vmatmul.mubr.msk.bf16.vlgmr.msra.gmra.mxu0 %vm924_vm1, %v916_v20 }
 0x2a4   : > { %2388 = vmatprep.mubr.msk.bf16.mxu0 %vm3012_vm0, %v3010_v4 }
 0x2a6   : > { %864 = vrot.lane.b32.xlu0 %v803_v7, %s3015_s1 }
 0x304   : > { %v851_v21 = vpop.permute.xlu1 %850 }
 0x305   : > { %v870_v40 = vmul.f32 0.17677669, %v851_v21 }
 0x308   : > { %v853_v22 = vpop.permute.xlu1 %852 }
 0x309   : > { %v871_v38 = vmul.f32 0.17677669, %v853_v22 }
 0x30b   : > { %v917_v44 = vpack.c.bf16 %v871_v38, %v870_v40 }
 0x30c   : > { %v2577_v23 = vpop.permute.xlu0 %2576  ;;  %v2582_v24 = vpop.permute.xlu1 %2581 }
 0x30d   : > { %v2579_v25 = vunpack.i.h.bf16 %v2577_v23  ;;  %v2578_v26 = vunpack.i.l.bf16 %v2577_v23  ;;  %v2584_v28 = vunpack.i.h.bf16 %v2582_v24  ;;  %v2583_v29 = vunpack.i.l.bf16 %v2582_v24 }
 0x30f   : > { %v921_v30 = vpack.c.bf16 %v2579_v25, %v2578_v26  ;;  %v922_v31 = vpack.c.bf16 %v2584_v28, %v2583_v29 }
 0x310   : > { %v2587_v32 = vpop.permute.xlu0 %2586  ;;  %v857_v36 = vpop.permute.xlu1 %856 }
 0x311   : > { %v2589_v33 = vunpack.i.h.bf16 %v2587_v32  ;;  %v2588_v34 = vunpack.i.l.bf16 %v2587_v32  ;;  %v976_v35 = vsel %vm924_vm1, %v921_v30, 0  ;;  %v1023_v37 = vsel %vm924_vm1, %v922_v31, 0 }
 0x312   : > { %2381 = vmatpush3.bf16.xpose.msra.mxu1 %v976_v35  ;;  %2387 = vmatpush3.bf16.xpose.msra.mxu0 %v1023_v37  ;;  %v872_v42 = vmul.f32 0.17677669, %v857_v36 }
 0x313   : > { %2392 = vmatprep.subr.bf16.mxu1 %v3010_v4  ;;  %2398 = vmatprep.subr.bf16.mxu0 %v3010_v4  ;;  %v923_v41 = vpack.c.bf16 %v2589_v33, %v2588_v34 }
 0x314   : > { %v859_v39 = vpop.permute.xlu0 %858  ;;  %v863_v48 = vpop.permute.xlu1 %862 }
 0x315   : > { %v873_v43 = vmul.f32 0.17677669, %v859_v39  ;;  %v1070_v47 = vsel %vm924_vm1, %v923_v41, 0  ;;  %v874_v50 = vmul.f32 0.17677669, %v863_v48 }
 0x317   : > { %v918_v45 = vpack.c.bf16 %v873_v43, %v872_v42 }
 0x318   : > { %v865_v46 = vpop.permute.xlu0 %864 }
 0x319   : > { %2383 = vmatmul.mubr.msk.bf16.vlgmr.msra.gmra.mxu1 %vm924_vm1, %v917_v44  ;;  %2389 = vmatmul.mubr.msk.bf16.vlgmr.msra.gmra.mxu0 %vm924_vm1, %v918_v45  ;;  %v875_v49 = vmul.f32 0.17677669, %v865_v46 }
 0x31a   : > { %2393 = vmatpush3.bf16.xpose.msra.mxu1 %v1070_v47  ;;  %2399 = vmatpush3.bf16.msra.mxu0 %v1206_v13 }
 0x31b   : > { %2394 = vmatprep.mubr.msk.bf16.mxu1 %vm3012_vm0, %v3010_v4  ;;  %2404 = vmatprep.subr.bf16.mxu1 %v3010_v4  ;;  %v919_v51 = vpack.c.bf16 %v875_v49, %v874_v50 }
 0x31c   : > { %2400 = vmatprep.mubr.msk.bf16.mxu0 %vm3012_vm0, %v3010_v4  ;;  %2410 = vmatprep.subr.bf16.mxu0 %v3010_v4 }
 0x321   : > { %2395 = vmatmul.mubr.msk.bf16.vlgmr.msra.gmra.mxu1 %vm924_vm1, %v919_v51 }
 0x322   : > { %2406 = vmatprep.mubr.msk.bf16.mxu1 %vm3012_vm0, %v3010_v4 }
 0x363   : > { %v965_v52 = vpop.f32.mrf.mxu0 }
 0x364   : > { %v1114_v53 = vsel %vm1113_vm2, %v965_v52, -inf }
 0x365   : > { %1115 = vmax.xlane.f32.xlu1 %v1114_v53  ;;  %v2378_v56 = vpop.f32.mrf.mxu0 }
 0x367   : > { %v968_v57 = vpop.f32.mrf.mxu0 }
 0x368   : > { %v1117_v58 = vsel %vm1113_vm2, %v968_v57, -inf }
 0x369   : > { %1118 = vmax.xlane.f32.xlu0 %v1117_v58  ;;  %v2379_v60 = vpop.f32.mrf.mxu0 }
 0x3d9   : > { %v1012_v61 = vpop.f32.mrf.mxu1  ;;  %v1059_v62 = vpop.f32.mrf.mxu0 }
 0x3da   : > { %v1120_v63 = vsel %vm1113_vm2, %v1012_v61, -inf  ;;  %v1126_v1 = vsel %vm1113_vm2, %v1059_v62, -inf }
 0x3db   : > { %v2384_v0 = vpop.f32.mrf.mxu1  ;;  %1121 = vmax.xlane.f32.xlu0 %v1120_v63  ;;  %1127 = vmax.xlane.f32.xlu1 %v1126_v1  ;;  %v2390_v2 = vpop.f32.mrf.mxu0 }
 0x3dd   : > { %v1015_v3 = vpop.f32.mrf.mxu1  ;;  %v1062_v5 = vpop.f32.mrf.mxu0 }
 0x3de   : > { %v1123_v6 = vsel %vm1113_vm2, %v1015_v3, -inf  ;;  %v1129_v11 = vsel %vm1113_vm2, %v1062_v5, -inf }
 0x3df   : > { %v2385_v7 = vpop.f32.mrf.mxu1  ;;  %1124 = vmax.xlane.f32.xlu0 %v1123_v6  ;;  %v2391_v8 = vpop.f32.mrf.mxu0 }
 0x3e1   : > { %v1106_v9 = vpop.f32.mrf.mxu1 }
 0x3e2   : > { %v1132_v10 = vsel %vm1113_vm2, %v1106_v9, -inf }
 0x3e3   : > { %v2396_v12 = vpop.f32.mrf.mxu1  ;;  %1133 = vmax.xlane.f32.xlu1 %v1132_v10  ;;  %1130 = vmax.xlane.f32.xlu0 %v1129_v11 }
 0x3e5   : > { %v1109_v13 = vpop.f32.mrf.mxu1 }
 0x3e6   : > { %v1135_v15 = vsel %vm1113_vm2, %v1109_v13, -inf }
 0x3e7   : > { %v2397_v16 = vpop.f32.mrf.mxu1  ;;  %1136 = vmax.xlane.f32.xlu0 %v1135_v15 }
 0x3ee   : > { %v1116_v20 = vpop.xlane.xlu1 %1115 }
 0x3ef   : > { %v1138_v21 = vsub.f32 %v965_v52, %v1116_v20 }
 0x3f1   : > { %v1146_v22 = vmul.f32 1.442695, %v1138_v21 }
 0x3f2   : > { %v1119_v17 = vpop.xlane.xlu0 %1118 }
 0x3f3   : > { %v1139_v18 = vsub.f32 %v968_v57, %v1119_v17 }
 0x3f4   : > { %2591 = vrot.lane.b32.xlu1 %v3345_v14, %s3013_s15  ;;  %s541_s15 = scalar_lea.vmem [#allocation14], %s2198_s22  ;;  %s2042_s22 = scalar_lea.sflag [#allocation4], %s3270_s20 }
 0x3f5   : > { %v1148_v19 = vmul.f32 1.442695, %v1139_v18 }
 0x3f7   : > { %2689 = vpow2.f32 %v1148_v19 }
 0x3f8   : > { %2691 = vpow2.f32 %v1146_v22 }
 0x404   : > { %v3385_v23 = vpop.eup %2689 }
 0x405   : > { %v1165_v24 = vsel %vm1113_vm2, %v3385_v23, 0.0  ;;  %v2692_v25 = vpop.eup %2691 }
 0x406   : > { %1166 = vadd.xlane.f32.xlu0 %v1165_v24  ;;  %v1162_v26 = vsel %vm1113_vm2, %v2692_v25, 0.0 }
 0x418   : > { %1163 = vadd.xlane.f32.xlu1 %v1162_v26 }
 0x464   : > { %v1122_v28 = vpop.xlane.xlu0 %1121  ;;  %v1128_v30 = vpop.xlane.xlu1 %1127 }
 0x465   : > { %v1140_v29 = vsub.f32 %v1012_v61, %v1122_v28  ;;  %v1142_v31 = vsub.f32 %v1059_v62, %v1128_v30 }
 0x467   : > { %v1150_v32 = vmul.f32 1.442695, %v1140_v29  ;;  %v1154_v33 = vmul.f32 1.442695, %v1142_v31 }
 0x468   : > { %v1125_v34 = vpop.xlane.xlu0 %1124 }
 0x469   : > { %2693 = vpow2.f32 %v1150_v32  ;;  %v1141_v35 = vsub.f32 %v1015_v3, %v1125_v34  ;;  %v2637_v34 = vld [vmem:[#allocation10 + $0x8] sm:$0xff]  }
 0x46a   : > { %2695 = vpow2.f32 %v1154_v33 }
 0x46b   : > { %v1152_v36 = vmul.f32 1.442695, %v1141_v35 }
 0x46c   : > { %v1134_v37 = vpop.xlane.xlu1 %1133  ;;  %v1131_v38 = vpop.xlane.xlu0 %1130 }
 0x46d   : > { %2697 = vpow2.f32 %v1152_v36  ;;  %v1144_v39 = vsub.f32 %v1106_v9, %v1134_v37  ;;  %v1143_v40 = vsub.f32 %v1062_v5, %v1131_v38 }
 0x46f   : > { %v1158_v41 = vmul.f32 1.442695, %v1144_v39  ;;  %v1156_v42 = vmul.f32 1.442695, %v1143_v40  ;;  %v2638_v39 = vld [vmem:[#allocation10] sm:$0xff]  }
 0x470   : > { %v2592_v43 = vpop.permute.xlu1 %2591  ;;  %v1137_v44 = vpop.xlane.xlu0 %1136 }
 0x471   : > { %2699 = vpow2.f32 %v1158_v41  ;;  %v2594_v45 = vunpack.i.h.bf16 %v2592_v43  ;;  %v2593_v46 = vunpack.i.l.bf16 %v2592_v43  ;;  %v1145_v47 = vsub.f32 %v1109_v13, %v1137_v44  ;;  %v2639_v41 = vld [vmem:[#allocation10 + $0x18] sm:$0xff]  }
 0x472   : > { %2701 = vpow2.f32 %v1156_v42  ;;  %v2640_v42 = vld [vmem:[#allocation10 + $0x10] sm:$0xff]  }
 0x473   : > { %v1207_v48 = vpack.c.bf16 %v2594_v45, %v2593_v46  ;;  %v1160_v49 = vmul.f32 1.442695, %v1145_v47  ;;  %v2641_v46 = vld [vmem:[#allocation10 + $0x28] sm:$0xff]  }
 0x475   : > { %2703 = vpow2.f32 %v1160_v49  ;;  %2405 = vmatpush3.bf16.msra.mxu1 %v1207_v48  ;;  %v2642_v49 = vld [vmem:[#allocation10 + $0x20] sm:$0xff]  }
 0x476   : > { %v2694_v50 = vpop.eup %2693  ;;  %2416 = vmatprep.subr.bf16.mxu1 %v3010_v4 }
 0x477   : > { %v1168_v51 = vsel %vm1113_vm2, %v2694_v50, 0.0  ;;  %v2696_v52 = vpop.eup %2695 }
 0x478   : > { %1169 = vadd.xlane.f32.xlu1 %v1168_v51  ;;  %v1174_v56 = vsel %vm1113_vm2, %v2696_v52, 0.0 }
 0x47a   : > { %v2698_v53 = vpop.eup %2697 }
 0x47b   : > { %v1171_v57 = vsel %vm1113_vm2, %v2698_v53, 0.0 }
 0x47c   : > { %1175 = vadd.xlane.f32.xlu1 %v1174_v56  ;;  %1172 = vadd.xlane.f32.xlu0 %v1171_v57  ;;  %v2643_v56 = vld [vmem:[#allocation10 + $0x38] sm:$0xff]  }
 0x47e   : > { %v2700_v58 = vpop.eup %2699 }
 0x47f   : > { %v2702_v60 = vpop.eup %2701  ;;  %v1180_v61 = vsel %vm1113_vm2, %v2700_v58, 0.0 }
 0x480   : > { %1181 = vadd.xlane.f32.xlu1 %v1180_v61  ;;  %v1177_v62 = vsel %vm1113_vm2, %v2702_v60, 0.0 }
 0x481   : > { %1178 = vadd.xlane.f32.xlu0 %v1177_v62 }
 0x482   : > { %v2704_v63 = vpop.eup %2703 }
 0x483   : > { %v1183_v0 = vsel %vm1113_vm2, %v2704_v63, 0.0 }
 0x485   : > { %1184 = vadd.xlane.f32.xlu0 %v1183_v0 }
 0x48f   : > { %v1167_v1 = vpop.xlane.xlu0 %1166 }
 0x490   : > { %2705 = vrcp.f32 %v1167_v1 }
 0x491   : > { %2601 = vrot.lane.b32.xlu1 %v3345_v14, %s3015_s1  ;;  %s2294_s1 = sshll.u32 %s3110_s14, 8  ;;  %s3016_s14 = smov [#allocation14]  }
 0x492   : > { %s3469_s3 = scalar_lea.hbm %s3526_s13, %s2294_s1  ;;  %s2923_s11 = sshll.u32 %s3016_s14, 4  ;;  %s2924_s11 = int_to_ptr.vmem [resolvable:$false] %s2923_s11 }
 0x493   : > { %s2925_s29 = scalar_lea.vmem %s2924_s11, 512 }
 0x49b   : > { %2596 = vrot.lane.b32.xlu0 %v3345_v14, %s3014_s16  ;;  %s2055_s16 = sshll.u32 %s541_s15, 4  ;;  %s3464_s16 = int_to_ptr.vmem [resolvable:$true] %s2055_s16 }
 0x49c   : > { %s2919_s19 = scalar_lea.vmem %s3464_s16, 256  ;;  %p2926_p5 = scmp.lt.s32.totalorder %s3464_s16, %s2924_s11 }
 0x49d   : > { %v2706_v3 = vpop.eup %2705  ;;  %p2920_p12 = scmp.ne.s32.totalorder %s3464_s16, %s2919_s19  ;;  %p2927_p8 = scmp.lt.s32.totalorder %s2925_s29, %s2919_s19 }
 0x49e   : > { %v1195_v7 = vmul.f32 %v2706_v3, %v3385_v23 }
 0x49f   : > { %p2921_p0 = pnand %p2920_p12, %p3565_p13  ;;  %p2928_p7 = por %p2927_p8, %p2926_p5 }
 0x4a1   : > { %v1164_v2 = vpop.xlane.xlu1 %1163  ;;  %p2922_p2 = pneg %p2921_p0 }
 0x4a2   : > { %2707 = vrcp.f32 %v1164_v2 }
 0x4a3   : > { %p2929_p6 = pnand %p2928_p7, %p2922_p2 }
 0x4af   : > { %v2708_v5 = vpop.eup %2707 }
 0x4b0   : > { %v1194_v6 = vmul.f32 %v2708_v5, %v2692_v25 }
 0x4b2   : > { %v1202_v8 = vpack.c.bf16 %v1195_v7, %v1194_v6 }
 0x4b4   : > { %2401 = vmatmul.mubr.msk.bf16.vlgmr.msra.gmra.mxu0 %vm1113_vm2, %v1202_v8 }
 0x4b5   : > { %2412 = vmatprep.mubr.msk.bf16.mxu0 %vm3012_vm0, %v3010_v4 }
 0x501   : > { %v1170_v9 = vpop.xlane.xlu1 %1169 }
 0x502   : > { %2709 = vrcp.f32 %v1170_v9 }
 0x505   : > { %v1176_v10 = vpop.xlane.xlu1 %1175  ;;  %v1173_v11 = vpop.xlane.xlu0 %1172 }
 0x506   : > { %2711 = vrcp.f32 %v1173_v11 }
 0x507   : > { %2713 = vrcp.f32 %v1176_v10 }
 0x509   : > { %v1182_v14 = vpop.xlane.xlu1 %1181 }
 0x50a   : > { %v1179_v12 = vpop.xlane.xlu0 %1178 }
 0x50b   : > { %2715 = vrcp.f32 %v1179_v12 }
 0x50c   : > { %2717 = vrcp.f32 %v1182_v14 }
 0x50d   : > { %v2602_v15 = vpop.permute.xlu1 %2601 }
 0x50e   : > { %v1185_v13 = vpop.xlane.xlu0 %1184  ;;  %v2604_v21 = vunpack.i.h.bf16 %v2602_v15  ;;  %v2603_v22 = vunpack.i.l.bf16 %v2602_v15 }
 0x50f   : > { %2719 = vrcp.f32 %v1185_v13  ;;  %v2710_v16 = vpop.eup %2709 }
 0x510   : > { %v1196_v24 = vmul.f32 %v2710_v16, %v2694_v50  ;;  %v1209_v30 = vpack.c.bf16 %v2604_v21, %v2603_v22 }
 0x512   : > { %v2597_v17 = vpop.permute.xlu0 %2596 }
 0x513   : > { %v2599_v18 = vunpack.i.h.bf16 %v2597_v17  ;;  %v2598_v19 = vunpack.i.l.bf16 %v2597_v17  ;;  %v2712_v20 = vpop.eup %2711 }
 0x514   : > { %v1197_v25 = vmul.f32 %v2712_v20, %v2698_v53  ;;  %v2714_v26 = vpop.eup %2713 }
 0x515   : > { %v1208_v23 = vpack.c.bf16 %v2599_v18, %v2598_v19  ;;  %v1198_v31 = vmul.f32 %v2714_v26, %v2696_v52  ;;  %v2252_v19 = vld [vmem:[%s3519_s6] ss:$0 sm:$0xff] }
 0x516   : > { %v1203_v28 = vpack.c.bf16 %v1197_v25, %v1196_v24 }
 0x517   : > { %2411 = vmatpush3.bf16.msra.mxu0 %v1208_v23 }
 0x518   : > { %v2716_v29 = vpop.eup %2715  ;;  %2422 = vmatprep.subr.bf16.mxu0 %v3010_v4  ;;  %2407 = vmatmul.mubr.msk.bf16.vlgmr.msra.gmra.mxu1 %vm1113_vm2, %v1203_v28 }
 0x519   : > { %v1199_v32 = vmul.f32 %v2716_v29, %v2702_v60  ;;  %v2718_v33 = vpop.eup %2717  ;;  %2417 = vmatpush3.bf16.msra.mxu1 %v1209_v30  ;;  %2418 = vmatprep.mubr.msk.bf16.mxu1 %vm3012_vm0, %v3010_v4  ;;  %v2733_v29 = vld [vmem:[%s3276_s5] sm:$0xff] }
 0x51a   : > { %2430 = vmatprep.subr.bf16.mxu1 %v3010_v4  ;;  %v1200_v37 = vmul.f32 %v2718_v33, %v2700_v58  ;;  %v2734_v33 = vld [vmem:[%s3276_s5 + $0x8] sm:$0xff] }
 0x51b   : > { %v1204_v35 = vpack.c.bf16 %v1199_v32, %v1198_v31 }
 0x51c   : > { %v2720_v36 = vpop.eup %2719 }
 0x51d   : > { %2413 = vmatmul.mubr.msk.bf16.vlgmr.msra.gmra.mxu0 %vm1113_vm2, %v1204_v35  ;;  %v1201_v38 = vmul.f32 %v2720_v36, %v2704_v63  ;;  %v2644_v63 = vld [vmem:[#allocation10 + $0x30] sm:$0xff]  }
 0x51e   : > { %2423 = vmatpush3.bf16.msra.mxu0 %v2637_v34  ;;  %2426 = vmatprep.mubr.msk.bf16.mxu0 %vm3012_vm0, %v3010_v4  ;;  %v2645_v35 = vld [vmem:[#allocation11 + $0x70] ss:$8 sps:$4 sm:$0xff]   ;;  %v2647_v36 = vld [vmem:[#allocation11 + $0x74] ss:$8 sps:$4 sm:$0xff]  }
 0x51f   : > { %v1205_v40 = vpack.c.bf16 %v1201_v38, %v1200_v37  ;;  %2424 = vmatprep.subr.bf16.mxu0 %v3010_v4 }
 0x521   : > { %2419 = vmatmul.mubr.msk.bf16.vlgmr.msra.gmra.mxu1 %vm1113_vm2, %v1205_v40 }
 0x522   : > { %2425 = vmatpush3.bf16.msra.mxu0 %v2638_v39  ;;  %2434 = vmatprep.mubr.msk.bf16.mxu1 %vm3012_vm0, %v3010_v4 }
 0x523   : > { %2438 = vmatprep.subr.bf16.mxu0 %v3010_v4  ;;  %2431 = vmatpush3.bf16.msra.mxu1 %v2639_v41 }
 0x524   : > { %2432 = vmatprep.subr.bf16.mxu1 %v3010_v4 }
 0x527   : > { %2433 = vmatpush3.bf16.msra.mxu1 %v2640_v42 }
 0x528   : > { %2446 = vmatprep.subr.bf16.mxu1 %v3010_v4 }
 0x574   : > { %v1247_v43 = vpop.f32.mrf.mxu0 }
 0x576   : > { %v2402_v44 = vpop.f32.mrf.mxu0 }
 0x578   : > { %v1250_v45 = vpop.f32.mrf.mxu0 }
 0x579   : > { %v1386_v47 = vpack.c.bf16 %v1250_v45, %v1247_v43  ;;  %v2650_v45 = vld [vmem:[#allocation11 + $0x64] ss:$8 sps:$4 sm:$0xff]  }
 0x57a   : > { %v2403_v48 = vpop.f32.mrf.mxu0 }
 0x57b   : > { %2427 = vmatmul.mubr.msk.bf16.vlgmr.msra.gmra.mxu0 %vm924_vm1, %v1386_v47  ;;  %v2653_v47 = vld [vmem:[#allocation11 + $0x54] ss:$8 sps:$4 sm:$0xff]   ;;  %v2651_v48 = vld [vmem:[#allocation11 + $0x50] ss:$8 sps:$4 sm:$0xff]  }
 0x57c   : > { %2439 = vmatpush3.bf16.msra.mxu0 %v2641_v46  ;;  %2442 = vmatprep.mubr.msk.bf16.mxu0 %vm3012_vm0, %v3010_v4  ;;  %v2648_v46 = vld [vmem:[#allocation11 + $0x60] ss:$8 sps:$4 sm:$0xff]  }
 0x57d   : > { %2440 = vmatprep.subr.bf16.mxu0 %v3010_v4 }
 0x580   : > { %2441 = vmatpush3.bf16.msra.mxu0 %v2642_v49  ;;  %v2654_v49 = vld [vmem:[#allocation11 + $0x40] ss:$8 sps:$4 sm:$0xff]  }
 0x581   : > { %1796 = vmatprep.subr.bf16.mxu0 %v2647_v36 }
 0x5d8   : > { %v1291_v50 = vpop.f32.mrf.mxu1 }
 0x5da   : > { %v2408_v51 = vpop.f32.mrf.mxu1 }
 0x5db   : > { %v2659_v51 = vld [vmem:[#allocation11 + $0x34] ss:$8 sps:$4 sm:$0xff]  }
 0x5dc   : > { %v1294_v52 = vpop.f32.mrf.mxu1 }
 0x5dd   : > { %v1335_v53 = vpop.f32.mrf.mxu0  ;;  %v1387_v57 = vpack.c.bf16 %v1294_v52, %v1291_v50  ;;  %v2656_v50 = vld [vmem:[#allocation11 + $0x44] ss:$8 sps:$4 sm:$0xff]   ;;  %v2657_v52 = vld [vmem:[#allocation11 + $0x30] ss:$8 sps:$4 sm:$0xff]  }
 0x5de   : > { %v2409_v58 = vpop.f32.mrf.mxu1 }
 0x5df   : > { %v2414_v60 = vpop.f32.mrf.mxu0  ;;  %2435 = vmatmul.mubr.msk.bf16.vlgmr.msra.gmra.mxu1 %vm924_vm1, %v1387_v57  ;;  %v2665_v57 = vld [vmem:[#allocation11 + $0x14] ss:$8 sps:$4 sm:$0xff]   ;;  %v2663_v58 = vld [vmem:[#allocation11 + $0x10] ss:$8 sps:$4 sm:$0xff]  }
 0x5e0   : > { %2447 = vmatpush3.bf16.msra.mxu1 %v2643_v56  ;;  %2450 = vmatprep.mubr.msk.bf16.mxu1 %vm3012_vm0, %v3010_v4  ;;  %v2660_v56 = vld [vmem:[#allocation11 + $0x20] ss:$8 sps:$4 sm:$0xff]   ;;  %v2668_v60 = vld [vmem:[#allocation11 + $0x4] ss:$8 sps:$4 sm:$0xff]  }
 0x5e1   : > { %v1338_v61 = vpop.f32.mrf.mxu0  ;;  %v1379_v62 = vpop.f32.mrf.mxu1  ;;  %2448 = vmatprep.subr.bf16.mxu1 %v3010_v4 }
 0x5e2   : > { %v1388_v0 = vpack.c.bf16 %v1338_v61, %v1335_v53  ;;  %v2662_v53 = vld [vmem:[#allocation11 + $0x24] ss:$8 sps:$4 sm:$0xff]   ;;  %v2666_v61 = vld [vmem:[#allocation11] ss:$8 sps:$4 sm:$0xff]  }
 0x5e3   : > { %v2415_v1 = vpop.f32.mrf.mxu0  ;;  %v2420_v2 = vpop.f32.mrf.mxu1 }
 0x5e4   : > { %2443 = vmatmul.mubr.msk.bf16.vlgmr.msra.gmra.mxu0 %vm924_vm1, %v1388_v0  ;;  %2449 = vmatpush3.bf16.msra.mxu1 %v2644_v63 }
 0x5e5   : > { %v1382_v3 = vpop.f32.mrf.mxu1  ;;  %1828 = vmatprep.mubr.bf16.mxu0 %v3011_v27  ;;  %1797 = vmatpush1.bf16.msra.mxu0 %v2645_v35 }
 0x5e6   : > { %v1389_v5 = vpack.c.bf16 %v1382_v3, %v1379_v62  ;;  %1798 = vmatprep.subr.bf16.mxu0 %v2650_v45 }
 0x5e7   : > { %v2421_v6 = vpop.f32.mrf.mxu1 }
 0x5e8   : > { %2451 = vmatmul.mubr.msk.bf16.vlgmr.msra.gmra.mxu1 %vm924_vm1, %v1389_v5 }
 0x5e9   : > { %1799 = vmatpush1.bf16.msra.mxu0 %v2648_v46 }
 0x5ea   : > { %1800 = vmatprep.subr.bf16.mxu0 %v2653_v47 }
 0x5ed   : > { %1801 = vmatpush1.bf16.msra.mxu0 %v2651_v48 }
 0x5ee   : > { %1802 = vmatprep.subr.bf16.mxu0 %v2656_v50 }
 0x5f1   : > { %1803 = vmatpush1.bf16.msra.mxu0 %v2654_v49 }
 0x5f2   : > { %1804 = vmatprep.subr.bf16.mxu0 %v2659_v51 }
 0x5f5   : > { %1805 = vmatpush1.bf16.msra.mxu0 %v2657_v52 }
 0x5f6   : > { %1806 = vmatprep.subr.bf16.mxu0 %v2662_v53 }
 0x5f9   : > { %1807 = vmatpush1.bf16.msra.mxu0 %v2660_v56 }
 0x5fa   : > { %1808 = vmatprep.subr.bf16.mxu0 %v2665_v57 }
 0x5fd   : > { %1809 = vmatpush1.bf16.msra.mxu0 %v2663_v58 }
 0x5fe   : > { %1810 = vmatprep.subr.bf16.mxu0 %v2668_v60 }
 0x601   : > { %1811 = vmatpush1.bf16.msra.mxu0 %v2666_v61 }
 0x63b   : > { %v1455_v7 = vpop.f32.mrf.mxu0 }
 0x63d   : > { %v2428_v8 = vpop.f32.mrf.mxu0 }
 0x63f   : > { %v1458_v9 = vpop.f32.mrf.mxu0 }
 0x641   : > { %v2429_v10 = vpop.f32.mrf.mxu0 }
 0x69f   : > { %v1511_v11 = vpop.f32.mrf.mxu1 }
 0x6a0   : > { %v1630_v13 = vadd.f32 %v1511_v11, %v1455_v7  ;;  %v2253_v7 = vld [vmem:[%s3520_s7] ss:$0 sm:$0xff] }
 0x6a1   : > { %v2436_v14 = vpop.f32.mrf.mxu1  ;;  %v2254_v11 = vld [vmem:[%s3521_s8] ss:$0 sm:$0xff] }
 0x6a3   : > { %v1514_v12 = vpop.f32.mrf.mxu1 }
 0x6a4   : > { %v1567_v4 = vpop.f32.mrf.mxu0  ;;  %v1633_v20 = vadd.f32 %v1514_v12, %v1458_v9 }
 0x6a5   : > { %v2437_v15 = vpop.f32.mrf.mxu1  ;;  %v1631_v17 = vadd.f32 %v1630_v13, %v1567_v4 }
 0x6a6   : > { %v2444_v16 = vpop.f32.mrf.mxu0  ;;  %v2669_v15 = vld [vmem:[#allocation13 + $0x78] sm:$0xff]  }
 0x6a7   : > { %v2670_v16 = vld [vmem:[#allocation13 + $0x38] sm:$0xff]   ;;  %2332 = vmatprep.subr.bf16.mxu1 %v2669_v15 }
 0x6a8   : > { %v1570_v18 = vpop.f32.mrf.mxu0  ;;  %v1623_v27 = vpop.f32.mrf.mxu1  ;;  %2333 = vmatpush3.bf16.msra.mxu1 %v2670_v16 }
 0x6a9   : > { %v1632_v21 = vadd.f32 %v1631_v17, %v1623_v27  ;;  %v1634_v24 = vadd.f32 %v1633_v20, %v1570_v18  ;;  %v2671_v17 = vld [vmem:[#allocation13 + $0x70] sm:$0xff]   ;;  %v2673_v27 = vld [vmem:[#allocation13 + $0x68] sm:$0xff]   ;;  %v2675_v20 = vld [vmem:[#allocation13 + $0x60] sm:$0xff]  }
 0x6aa   : > { %v2445_v22 = vpop.f32.mrf.mxu0  ;;  %v2452_v23 = vpop.f32.mrf.mxu1  ;;  %v2672_v18 = vld [vmem:[#allocation13 + $0x30] sm:$0xff]   ;;  %2334 = vmatprep.subr.bf16.mxu1 %v2671_v17 }
 0x6ab   : > { %v1643_v25 = vadd.f32 %v2252_v19, %v1632_v21  ;;  %v2676_v21 = vld [vmem:[#allocation13 + $0x20] sm:$0xff]   ;;  %v2677_v22 = vld [vmem:[#allocation13 + $0x58] sm:$0xff]  }
 0x6ac   : > { %v1626_v26 = vpop.f32.mrf.mxu1  ;;  %2335 = vmatpush3.bf16.msra.mxu1 %v2672_v18  ;;  %v2678_v23 = vld [vmem:[#allocation13 + $0x18] sm:$0xff]  }
 0x6ad   : > { %v1635_v28 = vadd.f32 %v1634_v24, %v1626_v26  ;;  %v3435_v30 = vadd.f32 %v2733_v29, %v1643_v25  ;;  %2336 = vmatprep.subr.bf16.mxu1 %v2673_v27  ;;  %v2679_v24 = vld [vmem:[#allocation13 + $0x50] sm:$0xff]   ;;  %v2681_v26 = vld [vmem:[#allocation13 + $0x48] sm:$0xff]   ;;  %v2683_v29 = vld [vmem:[#allocation13 + $0x40] sm:$0xff]  }
 0x6ae   : > { %v2453_v31 = vpop.f32.mrf.mxu1  ;;  %v2680_v25 = vld [vmem:[#allocation13 + $0x10] sm:$0xff]  }
 0x6af   : > { %v1644_v32 = vadd.f32 %v2252_v19, %v1635_v28  ;;  %1649 = vadd.xlane.f32.xlu1 %v3435_v30  ;;  %v2674_v19 = vld [vmem:[#allocation13 + $0x28] sm:$0xff]   ;;  %v2684_v31 = vld [vmem:[#allocation13] sm:$0xff]  }
 0x6b0   : > { %2337 = vmatpush3.bf16.msra.mxu1 %v2674_v19  ;;  %v2682_v28 = vld [vmem:[#allocation13 + $0x8] sm:$0xff]  }
 0x6b1   : > { %v3439_v34 = vadd.f32 %v2734_v33, %v1644_v32  ;;  %2338 = vmatprep.subr.bf16.mxu1 %v2675_v20  ;;  %v1704_v32 = vld [vmem:[%s3523_s10] sm:$0x3] }
 0x6b2   : > { %v1709_v33 = vrot.slane %v1704_v32, %v623_v55  ;;  %v1713_v35 = vrot.slane %v1704_v32, %v627_v59 }
 0x6b3   : > { %1651 = vadd.xlane.f32.xlu0 %v3439_v34 }
 0x6b4   : > { %2339 = vmatpush3.bf16.msra.mxu1 %v2676_v21 }
 0x6b5   : > { %2340 = vmatprep.subr.bf16.mxu1 %v2677_v22 }
 0x6b8   : > { %2341 = vmatpush3.bf16.msra.mxu1 %v2678_v23 }
 0x6b9   : > { %2342 = vmatprep.subr.bf16.mxu1 %v2679_v24 }
 0x6bc   : > { %2343 = vmatpush3.bf16.msra.mxu1 %v2680_v25 }
 0x6bd   : > { %2344 = vmatprep.subr.bf16.mxu1 %v2681_v26 }
 0x6c0   : > { %2345 = vmatpush3.bf16.msra.mxu1 %v2682_v28 }
 0x6c1   : > { %2346 = vmatprep.subr.bf16.mxu1 %v2683_v29 }
 0x6c4   : > { %2347 = vmatpush3.bf16.msra.mxu1 %v2684_v31 }
 0x738   : > { %v1650_v37 = vpop.xlane.xlu1 %1649 }
 0x739   : > { %v1653_v38 = vmul.f32 0.0078125, %v1650_v37 }
 0x73b   : > { %v1655_v39 = vsub.f32 %v3435_v30, %v1653_v38 }
 0x73c   : > { %v1652_v40 = vpop.xlane.xlu0 %1651 }
 0x73d   : > { %v1654_v41 = vmul.f32 0.0078125, %v1652_v40  ;;  %v1657_v42 = vmul.f32 %v1655_v39, %v1655_v39 }
 0x73f   : > { %v1656_v43 = vsub.f32 %v3439_v34, %v1654_v41  ;;  %1659 = vadd.xlane.f32.xlu0 %v1657_v42 }
 0x741   : > { %v1658_v44 = vmul.f32 %v1656_v43, %v1656_v43 }
 0x743   : > { %1661 = vadd.xlane.f32.xlu1 %v1658_v44 }
 0x7c8   : > { %v1660_v62 = vpop.xlane.xlu0 %1659 }
 0x7c9   : > { %v1663_v63 = vmul.f32 0.0078125, %v1660_v62 }
 0x7cb   : > { %v1665_v0 = vadd.f32 1e-05, %v1663_v63 }
 0x7cc   : > { %v1662_v1 = vpop.xlane.xlu1 %1661 }
 0x7cd   : > { %2721 = vrsqrt.f32 %v1665_v0  ;;  %v1664_v2 = vmul.f32 0.0078125, %v1662_v1 }
 0x7cf   : > { %v1666_v3 = vadd.f32 1e-05, %v1664_v2 }
 0x7d1   : > { %2723 = vrsqrt.f32 %v1666_v3  ;;  %v2271_v3 = vld [vmem:[%s3525_s12] ss:$0 sm:$0xff] }
 0x7da   : > { %v2722_v5 = vpop.eup %2721 }
 0x7db   : > { %v1669_v6 = vmul.f32 %v2722_v5, %v1655_v39 }
 0x7dd   : > { %v1677_v10 = vmul.f32 %v2253_v7, %v1669_v6 }
 0x7de   : > { %v2724_v8 = vpop.eup %2723 }
 0x7df   : > { %v1670_v9 = vmul.f32 %v2724_v8, %v1656_v43  ;;  %v1685_v12 = vadd.f32 %v2254_v11, %v1677_v10 }
 0x7e1   : > { %v1678_v14 = vmul.f32 %v2253_v7, %v1670_v9 }
 0x7e3   : > { %v1686_v4 = vadd.f32 %v2254_v11, %v1678_v14 }
 0x7e5   : > { %v1687_v13 = vpack.c.bf16 %v1686_v4, %v1685_v12 }
 0x7e7   : > { %1829 = vmatmul.mubr.bf16.vlgmr.msra.gmra.mxu0 %v1687_v13 }
 0x8a7   : > { %v1830_v36 = vpop.f32.mrf.mxu0 }
 0x8a8   : > { %v1831_v37 = vadd.f32 %v1830_v36, %v1709_v33 }
 0x8a9   : > { %v1832_v38 = vpop.f32.mrf.mxu0 }
 0x8aa   : > { %v1833_v39 = vadd.f32 %v1832_v38, %v1713_v35  ;;  %v1843_v40 = vmul.f32 0.70710677, %v1831_v37  ;;  %v1839_v58 = vmul.f32 0.5, %v1831_v37 }
 0x8ab   : > { %v1834_v41 = vpop.f32.mrf.mxu0 }
 0x8ac   : > { %v1844_v42 = vmul.f32 0.70710677, %v1833_v39  ;;  %v1835_v43 = vadd.f32 %v1834_v41, %v1709_v33  ;;  %v1840_v53 = vmul.f32 0.5, %v1833_v39 }
 0x8ad   : > { %v1836_v44 = vpop.f32.mrf.mxu0 }
 0x8ae   : > { %2725 = verf.f32 %v1844_v42  ;;  %v1845_v45 = vmul.f32 0.70710677, %v1835_v43  ;;  %v1837_v46 = vadd.f32 %v1836_v44, %v1713_v35  ;;  %v1841_v52 = vmul.f32 0.5, %v1835_v43 }
 0x8af   : > { %2727 = verf.f32 %v1843_v40 }
 0x8b0   : > { %2729 = verf.f32 %v1845_v45  ;;  %v1846_v47 = vmul.f32 0.70710677, %v1837_v46  ;;  %v1842_v56 = vmul.f32 0.5, %v1837_v46 }
 0x8b2   : > { %2731 = verf.f32 %v1846_v47 }
 0x8bb   : > { %v2726_v55 = vpop.eup %2725 }
 0x8bc   : > { %v2728_v48 = vpop.eup %2727  ;;  %v1852_v59 = vadd.f32 1.0, %v2726_v55 }
 0x8bd   : > { %v2730_v54 = vpop.eup %2729  ;;  %v1851_v51 = vadd.f32 1.0, %v2728_v48 }
 0x8be   : > { %v1853_v49 = vadd.f32 1.0, %v2730_v54  ;;  %v1856_v61 = vmul.f32 %v1852_v59, %v1840_v53 }
 0x8bf   : > { %v2732_v50 = vpop.eup %2731  ;;  %v1855_v63 = vmul.f32 %v1851_v51, %v1839_v58 }
 0x8c0   : > { %v1854_v57 = vadd.f32 1.0, %v2732_v50  ;;  %v1857_v60 = vmul.f32 %v1853_v49, %v1841_v52 }
 0x8c2   : > { %v1858_v62 = vmul.f32 %v1854_v57, %v1842_v56  ;;  %v1859_v1 = vpack.c.bf16 %v1857_v60, %v1855_v63 }
 0x8c4   : > { %v1860_v0 = vpack.c.bf16 %v1858_v62, %v1856_v61 }
 0x8c6   : > { %2028 = vmatprep.mubr.bf16.mxu1 %v1860_v0 }
 0x8c7   : > { %2029 = vmatmul.mubr.bf16.vlgmr.msra.gmra.mxu1 %v1859_v1 }
 0x987   : > { %v2348_v2 = vpop.f32.mrf.mxu1 }
 0x989   : > { %v2349_v5 = vpop.f32.mrf.mxu1 }
 0x98a   : > { %v2350_v6 = vadd.f32 %v2349_v5, %v2348_v2 }
 0x98b   : > { %v2351_v7 = vpop.f32.mrf.mxu1 }
 0x98c   : > { %v2031_v8 = vadd.f32 %v2350_v6, %v2271_v3 }
 0x98d   : > { %v2352_v9 = vpop.f32.mrf.mxu1 }
 0x98e   : > { %v2037_v10 = vadd.f32 %v2031_v8, %v3435_v30  ;;  %v2353_v11 = vadd.f32 %v2352_v9, %v2351_v7 }
 0x990   : > { %2039 = vst [vmem:[%s541_s15] sm:$0xff] %v2037_v10  ;;  %v2034_v14 = vadd.f32 %v2353_v11, %v2271_v3 }
 0x992   : > { %v2038_v12 = vadd.f32 %v2034_v14, %v3439_v34 }
 0x994   : > { %2040 = vst [vmem:[%s541_s15 + $0x8] sm:$0xff] %v2038_v12 }
 0x995   : > { %2932 = shalt.err (!%p2929_p6)
}
 0x996   : > { %s2933_s24 = scalar_lea.hbm %s3469_s3, 256  ;;  %s2937_s9 = scalar_lea.hbm %s3526_s13, 512 }
 0x997   : > { %p2934_p4 = scmp.ne.s32.totalorder %s3469_s3, %s2933_s24  ;;  %p2938_p9 = scmp.lt.s32.totalorder %s3469_s3, %s3526_s13 }
 0x998   : > { %p2939_p11 = scmp.lt.s32.totalorder %s2937_s9, %s2933_s24 }
 0x999   : > { %p2935_p1 = pnand %p2934_p4, %p3565_p13 }
 0x99a   : > { %p2940_p10 = por %p2939_p11, %p2938_p9 }
 0x99b   : > { %p2936_p3 = pneg %p2935_p1 }
 0x99d   : > { %p2941_p12 = pnand %p2940_p10, %p2936_p3 }
 0x99f   : > { %2944 = shalt.err (!%p2941_p12)
}
 0x9a0   : > { %s3017_s21 = smov 128   ;;  %s3018_s23 = smov 8  }
 0x9a1   : > { %2480 = dma.vmem_to_hbm [thread:$0]  (%p3565_p13), %s3464_s16, 256, %s3469_s3, %s2042_s22, %s3017_s21, %s3017_s21, %s3018_s23  }
 0x9a2 PF: > { %s2070_s19 = sand.u32 1, %s2983_s25   ;;  %p3566_p0 = scmp.ne.s32.totalorder %s3553_s17, 0 }
 0x9a3   : > { %p3567_p2 = scmp.ge.s32.totalorder %s2995_s28, 2  ;;  %s2071_s14 = scalar_lea.sflag [#allocation4], %s2070_s19 }
 0x9a5   : > { %p2506_p5 = pnand %p3567_p2, %p3566_p0 }
 0x9a7   : > { %p2507_p8 = pneg %p2506_p5 }
 0x9a9   : > { %2978 = dma.done.wait (%p2507_p8), %s2071_s14, 256  }
 0x9aa   : > { %2980 = vsyncadd (%p2507_p8), %s2071_s14, 4294967040  ;;  %s3568_s11 = sld [smem:[#allocation20_spill]]  ;;  %p29_p7 = scmp.ge.s32.totalorder %s3195_s18, 4  }
 0x9ab   : > { %s3569_s25 = smov %s2987_s26  ;;  %s3570_s26 = smov %s2991_s27 }
 0x9ac   : > { %s3572_s28 = smov %s3195_s18  ;;  %31 = sbr.rel (!%p29_p7) target bundleno = 15 (0xf), region = 141 }
 0x9b0   : > { %s3571_s27 = smov %s3568_s11 }
 0x9b1   :  { %2076 = vsyncpa [#allocation3], 1 }
 0x9b2   :  { %2078 = vsyncpa [#allocation3 + $0x1], 1 }
 0x9b3   :  { %2079 = vsyncpa [#allocation6], 1 }
 0x9b4   :  { %2080 = vsyncpa [#allocation9], 1 }
 0x9b5   :  { %2081 = vsyncpa [#allocation12], 1 }
 0x9b6   :  { %2082 = vsyncpa [#allocation4], 1 }
 0x9b7   :  { %2084 = vsyncpa [#allocation4 + $0x1], 1 }

</bundles_post_ra>
